<compile_context>
chip_gen: v7x
topology: tpu7x:2x2x1
jax: 0.10.0
libtpu: 0.0.40
codegen_flags: <defaults>
</compile_context>

<pallas_src>
import jax
import jax.numpy as jnp
import numpy as np
from jax import lax
from jax.experimental import pallas as pl
from jax.experimental.pallas import tpu as pltpu


def lstm_recurrence_kernel(gx_ref, whh_ref, b_ref, h_out_ref, h_sc, c_sc):
    """One (batch block, time chunk) grid step of the LSTM recurrence.

    gx_ref : (TT, BB, 4H) bf16  precomputed x_t @ W_ih^T for this time chunk
    whh_ref: (H, 4H)      bf16  hidden->gates weight (transposed)
    b_ref  : (1, 4H)      f32   b_ih + b_hh
    h_out_ref: (BB, H)    f32   h at the final timestep (written on last chunk)
    h_sc/c_sc: (BB, H)    f32   VMEM scratch carrying the LSTM state across
                                time chunks (persists across grid steps).
    """
    t_chunk = pl.program_id(1)

    @pl.when(t_chunk == 0)
    def _init():
        h_sc[...] = jnp.zeros_like(h_sc)
        c_sc[...] = jnp.zeros_like(c_sc)

    TT, BB, G = gx_ref.shape
    H = whh_ref.shape[0]

    # Hoist the bias broadcast out of the recurrence loop (no per-step
    # broadcast_in_dim; JAX does not CSE it).
    bias = jnp.broadcast_to(b_ref[...], (BB, G))

    def step(t, carry):
        h, c = carry
        # Only the hidden projection sits on the serial critical path.
        gates = (gx_ref[t].astype(jnp.float32) + bias
                 + jnp.dot(h.astype(jnp.bfloat16), whh_ref[...],
                           preferred_element_type=jnp.float32))
        # PyTorch LSTM gate order: input, forget, cell(g), output.
        # With H a multiple of 128 these lane slices are free vreg views.
        i = jax.nn.sigmoid(gates[:, 0:H])
        f = jax.nn.sigmoid(gates[:, H:2 * H])
        g = jnp.tanh(gates[:, 2 * H:3 * H])
        o = jax.nn.sigmoid(gates[:, 3 * H:4 * H])
        c_new = f * c + i * g
        h_new = o * jnp.tanh(c_new)
        return (h_new, c_new)

    # Capped partial unroll: LLO scheduling visibility without exploding
    # instruction count / vreg live ranges at realistic T.
    h, c = lax.fori_loop(0, TT, step, (h_sc[...], c_sc[...]),
                         unroll=min(8, TT))
    h_sc[...] = h
    c_sc[...] = c

    @pl.when(t_chunk == pl.num_programs(1) - 1)
    def _finalize():
        h_out_ref[...] = h


def _choose_batch_block(B):
    """MXU-friendly batch block: divisor of B, multiple of 8, split into >=2
    blocks when possible so the 'parallel' axis can use both v7x TensorCores."""
    for bb in (256, 128, 64, 32, 16, 8):
        if B % bb == 0:
            if B == bb and bb >= 16 and (bb // 2) % 8 == 0:
                return bb // 2          # two blocks instead of one
            return bb
    return B                            # tiny / odd B: single full block


def _choose_time_chunk(T, BB, G, budget_bytes=8 << 20):
    """Largest divisor of T whose double-buffered bf16 gates chunk fits budget."""
    per_step_bytes = BB * G * 2         # one timestep of bf16 gates_x
    max_tt = max(1, budget_bytes // (2 * per_step_bytes))
    tt = 1
    for cand in range(1, T + 1):
        if T % cand == 0 and cand <= max_tt:
            tt = cand
    return tt


def _vmem_limit_bytes(TT, BB, G, H):
    gx = 2 * TT * BB * G * 2            # double-buffered bf16 chunk
    whh = 2 * H * G * 2
    bias = 2 * G * 4
    out = 2 * BB * H * 4
    scratch = 2 * BB * H * 4
    est = gx + whh + bias + out + scratch
    # Generous headroom, but never above v7x's 64 MiB physical VMEM.
    return int(min(max(2 * est + (8 << 20), 16 << 20), 64 << 20))


@jax.jit
def knowledge_augmented_lstm_forward(tokens, prep):
    """tokens: (B, T) int32.  prep: inference-ready params.  Returns (B, V) f32."""
    B, T = tokens.shape
    emb_table = prep["emb_table"]            # (V, D) f32
    w_ih_bf = prep["w_ih_bf"]                # (D, 4H) bf16
    w_hh_bf = prep["w_hh_bf"]                # (H, 4H) bf16
    w_fc_bf = prep["w_fc_bf"]                # (H, V)  bf16
    b = prep["b"]                            # (1, 4H) f32  (b_ih + b_hh)
    b_fc = prep["b_fc"]                      # (1, V)  f32

    D = emb_table.shape[1]
    H = w_hh_bf.shape[0]
    G = 4 * H
    V = w_fc_bf.shape[1]

    # Embedding gather produces time-major data directly (no (B,T,D) transpose).
    x_tm = jnp.take(emb_table, tokens.T, axis=0)                    # (T, B, D)

    # Hoisted input projection: one matmul with M = T*B instead of T matmuls
    # on the serial recurrence path.  Stored bf16 to halve the HBM round-trip;
    # the bias is added inside the kernel in f32.
    gates_x = jnp.dot(x_tm.reshape(T * B, D).astype(jnp.bfloat16), w_ih_bf,
                      preferred_element_type=jnp.float32)
    gates_x = gates_x.astype(jnp.bfloat16).reshape(T, B, G)         # (T, B, 4H)

    BB = _choose_batch_block(B)
    TT = _choose_time_chunk(T, BB, G)
    grid = (B // BB, T // TT)

    cost = pl.CostEstimate(
        flops=2 * T * B * H * G,
        transcendentals=5 * T * B * H,
        bytes_accessed=T * B * G * 2 + H * G * 2 + G * 4 + B * H * 4,
    )

    h_last = pl.pallas_call(
        lstm_recurrence_kernel,
        out_shape=jax.ShapeDtypeStruct((B, H), jnp.float32),
        grid_spec=pltpu.PrefetchScalarGridSpec(
            num_scalar_prefetch=0,
            grid=grid,
            in_specs=[
                pl.BlockSpec((TT, BB, G), lambda bb, tt: (tt, bb, 0)),  # gates_x
                pl.BlockSpec((H, G), lambda bb, tt: (0, 0)),            # W_hh^T
                pl.BlockSpec((1, G), lambda bb, tt: (0, 0)),            # bias
            ],
            out_specs=pl.BlockSpec((BB, H), lambda bb, tt: (bb, 0)),
            scratch_shapes=[
                pltpu.VMEM((BB, H), jnp.float32),   # h carry
                pltpu.VMEM((BB, H), jnp.float32),   # c carry
            ],
        ),
        compiler_params=pltpu.CompilerParams(
            dimension_semantics=("parallel", "arbitrary"),
            vmem_limit_bytes=_vmem_limit_bytes(TT, BB, G, H),
        ),
        cost_estimate=cost,
    )(gates_x, w_hh_bf, b)

    # dropout(h_last) is identity at inference; FC runs in XLA so the (H, V)
    # weight is never VMEM-resident (safe for realistic vocab on v7x).
    logits = (jnp.dot(h_last.astype(jnp.bfloat16), w_fc_bf,
                      preferred_element_type=jnp.float32) + b_fc)
    return logits


def init_params(key, vocab_size, embedding_dim, knowledge_dim, rnn_units):
    D = embedding_dim + knowledge_dim
    H = rnn_units
    ks = jax.random.split(key, 8)
    s = 1.0 / np.sqrt(H)
    u = lambda k, shape, lim: jax.random.uniform(
        k, shape, jnp.float32, minval=-lim, maxval=lim)
    return {
        "word_emb": jax.random.normal(ks[0], (vocab_size, embedding_dim),
                                      jnp.float32),
        "know_emb": jax.random.normal(ks[1], (vocab_size, knowledge_dim),
                                      jnp.float32),
        # stored pre-transposed relative to PyTorch's (4H, D) / (4H, H)
        "w_ih_t": u(ks[2], (D, 4 * H), s),
        "w_hh_t": u(ks[3], (H, 4 * H), s),
        "b_ih": u(ks[4], (4 * H,), s),
        "b_hh": u(ks[5], (4 * H,), s),
        "w_fc_t": u(ks[6], (H, vocab_size), s),
        "b_fc": u(ks[7], (vocab_size,), s),
    }


def prepare_inference_params(params):
    """One-time prep: concat embeddings, fold biases, cast weights to bf16."""
    H = params["w_hh_t"].shape[0]
    V = params["w_fc_t"].shape[1]
    return {
        "emb_table": jnp.concatenate(
            [params["word_emb"], params["know_emb"]], axis=-1),    # (V, D)
        "w_ih_bf": params["w_ih_t"].astype(jnp.bfloat16),          # (D, 4H)
        "w_hh_bf": params["w_hh_t"].astype(jnp.bfloat16),          # (H, 4H)
        "w_fc_bf": params["w_fc_t"].astype(jnp.bfloat16),          # (H, V)
        "b": (params["b_ih"] + params["b_hh"]).reshape(1, 4 * H),  # (1, 4H)
        "b_fc": params["b_fc"].reshape(1, V),                      # (1, V)
    }


def reference_forward(tokens, params):
    """Pure-JAX f32 reference (mirrors the PyTorch forward, eval mode)."""
    emb = jnp.concatenate([params["word_emb"], params["know_emb"]], axis=-1)
    x = jnp.take(emb, tokens, axis=0)                              # (B, T, D)
    H = params["w_hh_t"].shape[0]
    b = params["b_ih"] + params["b_hh"]

    def step(carry, x_t):
        h, c = carry
        gates = x_t @ params["w_ih_t"] + h @ params["w_hh_t"] + b
        i = jax.nn.sigmoid(gates[:, 0:H])
        f = jax.nn.sigmoid(gates[:, H:2 * H])
        g = jnp.tanh(gates[:, 2 * H:3 * H])
        o = jax.nn.sigmoid(gates[:, 3 * H:4 * H])
        c = f * c + i * g
        h = o * jnp.tanh(c)
        return (h, c), None

    B = tokens.shape[0]
    h0 = jnp.zeros((B, H), jnp.float32)
    (h, _), _ = lax.scan(step, (h0, h0), jnp.transpose(x, (1, 0, 2)))
    return h @ params["w_fc_t"] + params["b_fc"]


def matched_precision_reference(tokens, prep):
    """Pure-JAX reference using the same bf16-operand / f32-accum math."""
    B, T = tokens.shape
    emb_table = prep["emb_table"]
    D = emb_table.shape[1]
    H = prep["w_hh_bf"].shape[0]
    G = 4 * H

    x_tm = jnp.take(emb_table, tokens.T, axis=0)
    gates_x = jnp.dot(x_tm.reshape(T * B, D).astype(jnp.bfloat16),
                      prep["w_ih_bf"], preferred_element_type=jnp.float32)
    gates_x = gates_x.astype(jnp.bfloat16).reshape(T, B, G)

    def step(carry, gx_t):
        h, c = carry
        gates = (gx_t.astype(jnp.float32) + prep["b"]
                 + jnp.dot(h.astype(jnp.bfloat16), prep["w_hh_bf"],
                           preferred_element_type=jnp.float32))
        i = jax.nn.sigmoid(gates[:, 0:H])
        f = jax.nn.sigmoid(gates[:, H:2 * H])
        g = jnp.tanh(gates[:, 2 * H:3 * H])
        o = jax.nn.sigmoid(gates[:, 3 * H:4 * H])
        c = f * c + i * g
        h = o * jnp.tanh(c)
        return (h, c), None

    h0 = jnp.zeros((B, H), jnp.float32)
    (h, _), _ = lax.scan(step, (h0, h0), gates_x)
    return (jnp.dot(h.astype(jnp.bfloat16), prep["w_fc_bf"],
                    preferred_element_type=jnp.float32) + prep["b_fc"])


if __name__ == "__main__":
    # Small, TPU-tile-friendly shapes consistent with the module.
    VOCAB = 256
    EMB_DIM = 96
    KNOW_DIM = 32        # input size D = 128
    RNN_UNITS = 128      # H multiple of 128 -> gate slices are free vreg views
    B, T = 8, 8

    key = jax.random.PRNGKey(0)
    kp, kx = jax.random.split(key)
    params = init_params(kp, VOCAB, EMB_DIM, KNOW_DIM, RNN_UNITS)
    prep = prepare_inference_params(params)
    tokens = jax.random.randint(kx, (B, T), 0, VOCAB, dtype=jnp.int32)

    out = knowledge_augmented_lstm_forward(tokens, prep)
    out = jax.block_until_ready(out)
    assert out.shape == (B, VOCAB)

    # Tight check vs. a reference using identical bf16/f32 mixed precision.
    ref_matched = matched_precision_reference(tokens, prep)
    np.testing.assert_allclose(np.asarray(out), np.asarray(ref_matched),
                               rtol=2e-3, atol=2e-3)

    # Looser check vs. the pure-f32 (PyTorch-semantics) reference; slack
    # accounts for bf16 matmul operands (error grows with T).
    ref_f32 = reference_forward(tokens, params)
    np.testing.assert_allclose(np.asarray(out), np.asarray(ref_f32),
                               rtol=5e-2, atol=5e-2)

    print("KERNEL_OK")
</pallas_src>

<mosaic_0001>
module attributes {stable_mosaic.version = 11 : i64} {
  func.func @lstm_recurrence_kernel(%arg0: i32, %arg1: i32, %arg2: memref<8x8x512xbf16, #tpu.memory_space<vmem>>, %arg3: memref<128x512xbf16, #tpu.memory_space<vmem>>, %arg4: memref<1x512xf32, #tpu.memory_space<vmem>>, %arg5: memref<8x128xf32, #tpu.memory_space<vmem>>, %arg6: memref<8x128xf32, #tpu.memory_space<vmem>>, %arg7: memref<8x128xf32, #tpu.memory_space<vmem>>) attributes {dimension_semantics = [#tpu.dimension_semantics<parallel>, #tpu.dimension_semantics<arbitrary>], iteration_bounds = array<i64: 1, 1>, scalar_prefetch = 0 : i64, scratch_operands = 2 : i64, tpu.core_type = #tpu.core_type<tc>, window_params = [{transform_indices = @transform_0, window_bounds = array<i64: 8, 8, 512>}, {pipeline_mode = #tpu.pipeline_mode<synchronous>, transform_indices = @transform_1, window_bounds = array<i64: 128, 512>}, {pipeline_mode = #tpu.pipeline_mode<synchronous>, transform_indices = @transform_2, window_bounds = array<i64: 1, 512>}, {transform_indices = @transform_3, window_bounds = array<i64: 8, 128>}]} {
    %c0_i32 = arith.constant 0 : i32
    %0 = arith.cmpi eq, %arg1, %c0_i32 : i32
    %1 = arith.extui %0 : i1 to i32
    %c0_i32_0 = arith.constant 0 : i32
    %2 = arith.cmpi ne, %1, %c0_i32_0 : i32
    scf.if %2 {
      %cst_76 = arith.constant 0.000000e+00 : f32
      %285 = vector.broadcast %cst_76 : f32 to vector<8x128xf32>
      %c0_77 = arith.constant 0 : index
      %c0_78 = arith.constant 0 : index
      %286 = vector.load %arg6[%c0_77, %c0_78] : memref<8x128xf32, #tpu.memory_space<vmem>>, vector<8x128xf32>
      tpu.vector_store %arg6[%c0_77, %c0_78], %285 {strides = array<i32>} : memref<8x128xf32, #tpu.memory_space<vmem>>, vector<8x128xf32>,
      %cst_79 = arith.constant 0.000000e+00 : f32
      %287 = vector.broadcast %cst_79 : f32 to vector<8x128xf32>
      %c0_80 = arith.constant 0 : index
      %c0_81 = arith.constant 0 : index
      %288 = vector.load %arg7[%c0_80, %c0_81] : memref<8x128xf32, #tpu.memory_space<vmem>>, vector<8x128xf32>
      tpu.vector_store %arg7[%c0_80, %c0_81], %287 {strides = array<i32>} : memref<8x128xf32, #tpu.memory_space<vmem>>, vector<8x128xf32>,
    } else {
    }
    %c0 = arith.constant 0 : index
    %c0_1 = arith.constant 0 : index
    %3 = vector.load %arg4[%c0, %c0_1] : memref<1x512xf32, #tpu.memory_space<vmem>>, vector<1x512xf32>
    %4 = vector.shape_cast %3 : vector<1x512xf32> to vector<1x512xf32>
    %5 = vector.broadcast %4 : vector<1x512xf32> to vector<8x512xf32>
    %c0_2 = arith.constant 0 : index
    %c0_3 = arith.constant 0 : index
    %6 = vector.load %arg6[%c0_2, %c0_3] : memref<8x128xf32, #tpu.memory_space<vmem>>, vector<8x128xf32>
    %c0_4 = arith.constant 0 : index
    %c0_5 = arith.constant 0 : index
    %7 = vector.load %arg7[%c0_4, %c0_5] : memref<8x128xf32, #tpu.memory_space<vmem>>, vector<8x128xf32>
    %c0_i32_6 = arith.constant 0 : i32
    %8 = arith.index_cast %c0_i32_6 : i32 to index
    %c0_7 = arith.constant 0 : index
    %c0_8 = arith.constant 0 : index
    %9 = vector.load %arg2[%8, %c0_7, %c0_8] : memref<8x8x512xbf16, #tpu.memory_space<vmem>>, vector<1x8x512xbf16>
    %10 = vector.shape_cast %9 : vector<1x8x512xbf16> to vector<8x512xbf16>
    %11 = arith.extf %10 : vector<8x512xbf16> to vector<8x512xf32>
    %12 = arith.addf %11, %5 : vector<8x512xf32>
    %13 = arith.truncf %6 : vector<8x128xf32> to vector<8x128xbf16>
    %c0_9 = arith.constant 0 : index
    %c0_10 = arith.constant 0 : index
    %14 = vector.load %arg3[%c0_9, %c0_10] : memref<128x512xbf16, #tpu.memory_space<vmem>>, vector<128x512xbf16>
    %cst = arith.constant dense<0.000000e+00> : vector<8x512xf32>
    %15 = tpu.matmul %13, %14, %cst {dimension_numbers = #tpu.dot_dimension_numbers<[1], [0], [0], [1], [0, 0, 1, 1], [], []>} : vector<8x128xbf16>, vector<128x512xbf16>, vector<8x512xf32> -> vector<8x512xf32>
    %16 = arith.addf %12, %15 : vector<8x512xf32>
    %17 = vector.extract_strided_slice %16 {offsets = [0, 0], sizes = [8, 128], strides = [1, 1]} : vector<8x512xf32> to vector<8x128xf32>
    %18 = arith.negf %17 : vector<8x128xf32>
    %19 = math.exp %18 : vector<8x128xf32>
    %cst_11 = arith.constant 1.000000e+00 : f32
    %20 = vector.broadcast %cst_11 : f32 to vector<8x128xf32>
    %21 = arith.addf %20, %19 : vector<8x128xf32>
    %22 = arith.divf %20, %21 : vector<8x128xf32>
    %23 = vector.extract_strided_slice %16 {offsets = [0, 128], sizes = [8, 128], strides = [1, 1]} : vector<8x512xf32> to vector<8x128xf32>
    %24 = arith.negf %23 : vector<8x128xf32>
    %25 = math.exp %24 : vector<8x128xf32>
    %cst_12 = arith.constant 1.000000e+00 : f32
    %26 = vector.broadcast %cst_12 : f32 to vector<8x128xf32>
    %27 = arith.addf %26, %25 : vector<8x128xf32>
    %28 = arith.divf %26, %27 : vector<8x128xf32>
    %29 = vector.extract_strided_slice %16 {offsets = [0, 256], sizes = [8, 128], strides = [1, 1]} : vector<8x512xf32> to vector<8x128xf32>
    %30 = math.tanh %29 : vector<8x128xf32>
    %31 = vector.extract_strided_slice %16 {offsets = [0, 384], sizes = [8, 128], strides = [1, 1]} : vector<8x512xf32> to vector<8x128xf32>
    %32 = arith.negf %31 : vector<8x128xf32>
    %33 = math.exp %32 : vector<8x128xf32>
    %cst_13 = arith.constant 1.000000e+00 : f32
    %34 = vector.broadcast %cst_13 : f32 to vector<8x128xf32>
    %35 = arith.addf %34, %33 : vector<8x128xf32>
    %36 = arith.divf %34, %35 : vector<8x128xf32>
    %37 = arith.mulf %28, %7 : vector<8x128xf32>
    %38 = arith.mulf %22, %30 : vector<8x128xf32>
    %39 = arith.addf %37, %38 : vector<8x128xf32>
    %40 = math.tanh %39 : vector<8x128xf32>
    %41 = arith.mulf %36, %40 : vector<8x128xf32>
    %c1_i32 = arith.constant 1 : i32
    %42 = arith.index_cast %c1_i32 : i32 to index
    %c0_14 = arith.constant 0 : index
    %c0_15 = arith.constant 0 : index
    %43 = vector.load %arg2[%42, %c0_14, %c0_15] : memref<8x8x512xbf16, #tpu.memory_space<vmem>>, vector<1x8x512xbf16>
    %44 = vector.shape_cast %43 : vector<1x8x512xbf16> to vector<8x512xbf16>
    %45 = arith.extf %44 : vector<8x512xbf16> to vector<8x512xf32>
    %46 = arith.addf %45, %5 : vector<8x512xf32>
    %47 = arith.truncf %41 : vector<8x128xf32> to vector<8x128xbf16>
    %c0_16 = arith.constant 0 : index
    %c0_17 = arith.constant 0 : index
    %48 = vector.load %arg3[%c0_16, %c0_17] : memref<128x512xbf16, #tpu.memory_space<vmem>>, vector<128x512xbf16>
    %cst_18 = arith.constant dense<0.000000e+00> : vector<8x512xf32>
    %49 = tpu.matmul %47, %48, %cst_18 {dimension_numbers = #tpu.dot_dimension_numbers<[1], [0], [0], [1], [0, 0, 1, 1], [], []>} : vector<8x128xbf16>, vector<128x512xbf16>, vector<8x512xf32> -> vector<8x512xf32>
    %50 = arith.addf %46, %49 : vector<8x512xf32>
    %51 = vector.extract_strided_slice %50 {offsets = [0, 0], sizes = [8, 128], strides = [1, 1]} : vector<8x512xf32> to vector<8x128xf32>
    %52 = arith.negf %51 : vector<8x128xf32>
    %53 = math.exp %52 : vector<8x128xf32>
    %cst_19 = arith.constant 1.000000e+00 : f32
    %54 = vector.broadcast %cst_19 : f32 to vector<8x128xf32>
    %55 = arith.addf %54, %53 : vector<8x128xf32>
    %56 = arith.divf %54, %55 : vector<8x128xf32>
    %57 = vector.extract_strided_slice %50 {offsets = [0, 128], sizes = [8, 128], strides = [1, 1]} : vector<8x512xf32> to vector<8x128xf32>
    %58 = arith.negf %57 : vector<8x128xf32>
    %59 = math.exp %58 : vector<8x128xf32>
    %cst_20 = arith.constant 1.000000e+00 : f32
    %60 = vector.broadcast %cst_20 : f32 to vector<8x128xf32>
    %61 = arith.addf %60, %59 : vector<8x128xf32>
    %62 = arith.divf %60, %61 : vector<8x128xf32>
    %63 = vector.extract_strided_slice %50 {offsets = [0, 256], sizes = [8, 128], strides = [1, 1]} : vector<8x512xf32> to vector<8x128xf32>
    %64 = math.tanh %63 : vector<8x128xf32>
    %65 = vector.extract_strided_slice %50 {offsets = [0, 384], sizes = [8, 128], strides = [1, 1]} : vector<8x512xf32> to vector<8x128xf32>
    %66 = arith.negf %65 : vector<8x128xf32>
    %67 = math.exp %66 : vector<8x128xf32>
    %cst_21 = arith.constant 1.000000e+00 : f32
    %68 = vector.broadcast %cst_21 : f32 to vector<8x128xf32>
    %69 = arith.addf %68, %67 : vector<8x128xf32>
    %70 = arith.divf %68, %69 : vector<8x128xf32>
    %71 = arith.mulf %62, %39 : vector<8x128xf32>
    %72 = arith.mulf %56, %64 : vector<8x128xf32>
    %73 = arith.addf %71, %72 : vector<8x128xf32>
    %74 = math.tanh %73 : vector<8x128xf32>
    %75 = arith.mulf %70, %74 : vector<8x128xf32>
    %c2_i32 = arith.constant 2 : i32
    %76 = arith.index_cast %c2_i32 : i32 to index
    %c0_22 = arith.constant 0 : index
    %c0_23 = arith.constant 0 : index
    %77 = vector.load %arg2[%76, %c0_22, %c0_23] : memref<8x8x512xbf16, #tpu.memory_space<vmem>>, vector<1x8x512xbf16>
    %78 = vector.shape_cast %77 : vector<1x8x512xbf16> to vector<8x512xbf16>
    %79 = arith.extf %78 : vector<8x512xbf16> to vector<8x512xf32>
    %80 = arith.addf %79, %5 : vector<8x512xf32>
    %81 = arith.truncf %75 : vector<8x128xf32> to vector<8x128xbf16>
    %c0_24 = arith.constant 0 : index
    %c0_25 = arith.constant 0 : index
    %82 = vector.load %arg3[%c0_24, %c0_25] : memref<128x512xbf16, #tpu.memory_space<vmem>>, vector<128x512xbf16>
    %cst_26 = arith.constant dense<0.000000e+00> : vector<8x512xf32>
    %83 = tpu.matmul %81, %82, %cst_26 {dimension_numbers = #tpu.dot_dimension_numbers<[1], [0], [0], [1], [0, 0, 1, 1], [], []>} : vector<8x128xbf16>, vector<128x512xbf16>, vector<8x512xf32> -> vector<8x512xf32>
    %84 = arith.addf %80, %83 : vector<8x512xf32>
    %85 = vector.extract_strided_slice %84 {offsets = [0, 0], sizes = [8, 128], strides = [1, 1]} : vector<8x512xf32> to vector<8x128xf32>
    %86 = arith.negf %85 : vector<8x128xf32>
    %87 = math.exp %86 : vector<8x128xf32>
    %cst_27 = arith.constant 1.000000e+00 : f32
    %88 = vector.broadcast %cst_27 : f32 to vector<8x128xf32>
    %89 = arith.addf %88, %87 : vector<8x128xf32>
    %90 = arith.divf %88, %89 : vector<8x128xf32>
    %91 = vector.extract_strided_slice %84 {offsets = [0, 128], sizes = [8, 128], strides = [1, 1]} : vector<8x512xf32> to vector<8x128xf32>
    %92 = arith.negf %91 : vector<8x128xf32>
    %93 = math.exp %92 : vector<8x128xf32>
    %cst_28 = arith.constant 1.000000e+00 : f32
    %94 = vector.broadcast %cst_28 : f32 to vector<8x128xf32>
    %95 = arith.addf %94, %93 : vector<8x128xf32>
    %96 = arith.divf %94, %95 : vector<8x128xf32>
    %97 = vector.extract_strided_slice %84 {offsets = [0, 256], sizes = [8, 128], strides = [1, 1]} : vector<8x512xf32> to vector<8x128xf32>
    %98 = math.tanh %97 : vector<8x128xf32>
    %99 = vector.extract_strided_slice %84 {offsets = [0, 384], sizes = [8, 128], strides = [1, 1]} : vector<8x512xf32> to vector<8x128xf32>
    %100 = arith.negf %99 : vector<8x128xf32>
    %101 = math.exp %100 : vector<8x128xf32>
    %cst_29 = arith.constant 1.000000e+00 : f32
    %102 = vector.broadcast %cst_29 : f32 to vector<8x128xf32>
    %103 = arith.addf %102, %101 : vector<8x128xf32>
    %104 = arith.divf %102, %103 : vector<8x128xf32>
    %105 = arith.mulf %96, %73 : vector<8x128xf32>
    %106 = arith.mulf %90, %98 : vector<8x128xf32>
    %107 = arith.addf %105, %106 : vector<8x128xf32>
    %108 = math.tanh %107 : vector<8x128xf32>
    %109 = arith.mulf %104, %108 : vector<8x128xf32>
    %c3_i32 = arith.constant 3 : i32
    %110 = arith.index_cast %c3_i32 : i32 to index
    %c0_30 = arith.constant 0 : index
    %c0_31 = arith.constant 0 : index
    %111 = vector.load %arg2[%110, %c0_30, %c0_31] : memref<8x8x512xbf16, #tpu.memory_space<vmem>>, vector<1x8x512xbf16>
    %112 = vector.shape_cast %111 : vector<1x8x512xbf16> to vector<8x512xbf16>
    %113 = arith.extf %112 : vector<8x512xbf16> to vector<8x512xf32>
    %114 = arith.addf %113, %5 : vector<8x512xf32>
    %115 = arith.truncf %109 : vector<8x128xf32> to vector<8x128xbf16>
    %c0_32 = arith.constant 0 : index
    %c0_33 = arith.constant 0 : index
    %116 = vector.load %arg3[%c0_32, %c0_33] : memref<128x512xbf16, #tpu.memory_space<vmem>>, vector<128x512xbf16>
    %cst_34 = arith.constant dense<0.000000e+00> : vector<8x512xf32>
    %117 = tpu.matmul %115, %116, %cst_34 {dimension_numbers = #tpu.dot_dimension_numbers<[1], [0], [0], [1], [0, 0, 1, 1], [], []>} : vector<8x128xbf16>, vector<128x512xbf16>, vector<8x512xf32> -> vector<8x512xf32>
    %118 = arith.addf %114, %117 : vector<8x512xf32>
    %119 = vector.extract_strided_slice %118 {offsets = [0, 0], sizes = [8, 128], strides = [1, 1]} : vector<8x512xf32> to vector<8x128xf32>
    %120 = arith.negf %119 : vector<8x128xf32>
    %121 = math.exp %120 : vector<8x128xf32>
    %cst_35 = arith.constant 1.000000e+00 : f32
    %122 = vector.broadcast %cst_35 : f32 to vector<8x128xf32>
    %123 = arith.addf %122, %121 : vector<8x128xf32>
    %124 = arith.divf %122, %123 : vector<8x128xf32>
    %125 = vector.extract_strided_slice %118 {offsets = [0, 128], sizes = [8, 128], strides = [1, 1]} : vector<8x512xf32> to vector<8x128xf32>
    %126 = arith.negf %125 : vector<8x128xf32>
    %127 = math.exp %126 : vector<8x128xf32>
    %cst_36 = arith.constant 1.000000e+00 : f32
    %128 = vector.broadcast %cst_36 : f32 to vector<8x128xf32>
    %129 = arith.addf %128, %127 : vector<8x128xf32>
    %130 = arith.divf %128, %129 : vector<8x128xf32>
    %131 = vector.extract_strided_slice %118 {offsets = [0, 256], sizes = [8, 128], strides = [1, 1]} : vector<8x512xf32> to vector<8x128xf32>
    %132 = math.tanh %131 : vector<8x128xf32>
    %133 = vector.extract_strided_slice %118 {offsets = [0, 384], sizes = [8, 128], strides = [1, 1]} : vector<8x512xf32> to vector<8x128xf32>
    %134 = arith.negf %133 : vector<8x128xf32>
    %135 = math.exp %134 : vector<8x128xf32>
    %cst_37 = arith.constant 1.000000e+00 : f32
    %136 = vector.broadcast %cst_37 : f32 to vector<8x128xf32>
    %137 = arith.addf %136, %135 : vector<8x128xf32>
    %138 = arith.divf %136, %137 : vector<8x128xf32>
    %139 = arith.mulf %130, %107 : vector<8x128xf32>
    %140 = arith.mulf %124, %132 : vector<8x128xf32>
    %141 = arith.addf %139, %140 : vector<8x128xf32>
    %142 = math.tanh %141 : vector<8x128xf32>
    %143 = arith.mulf %138, %142 : vector<8x128xf32>
    %c4_i32 = arith.constant 4 : i32
    %144 = arith.index_cast %c4_i32 : i32 to index
    %c0_38 = arith.constant 0 : index
    %c0_39 = arith.constant 0 : index
    %145 = vector.load %arg2[%144, %c0_38, %c0_39] : memref<8x8x512xbf16, #tpu.memory_space<vmem>>, vector<1x8x512xbf16>
    %146 = vector.shape_cast %145 : vector<1x8x512xbf16> to vector<8x512xbf16>
    %147 = arith.extf %146 : vector<8x512xbf16> to vector<8x512xf32>
    %148 = arith.addf %147, %5 : vector<8x512xf32>
    %149 = arith.truncf %143 : vector<8x128xf32> to vector<8x128xbf16>
    %c0_40 = arith.constant 0 : index
    %c0_41 = arith.constant 0 : index
    %150 = vector.load %arg3[%c0_40, %c0_41] : memref<128x512xbf16, #tpu.memory_space<vmem>>, vector<128x512xbf16>
    %cst_42 = arith.constant dense<0.000000e+00> : vector<8x512xf32>
    %151 = tpu.matmul %149, %150, %cst_42 {dimension_numbers = #tpu.dot_dimension_numbers<[1], [0], [0], [1], [0, 0, 1, 1], [], []>} : vector<8x128xbf16>, vector<128x512xbf16>, vector<8x512xf32> -> vector<8x512xf32>
    %152 = arith.addf %148, %151 : vector<8x512xf32>
    %153 = vector.extract_strided_slice %152 {offsets = [0, 0], sizes = [8, 128], strides = [1, 1]} : vector<8x512xf32> to vector<8x128xf32>
    %154 = arith.negf %153 : vector<8x128xf32>
    %155 = math.exp %154 : vector<8x128xf32>
    %cst_43 = arith.constant 1.000000e+00 : f32
    %156 = vector.broadcast %cst_43 : f32 to vector<8x128xf32>
    %157 = arith.addf %156, %155 : vector<8x128xf32>
    %158 = arith.divf %156, %157 : vector<8x128xf32>
    %159 = vector.extract_strided_slice %152 {offsets = [0, 128], sizes = [8, 128], strides = [1, 1]} : vector<8x512xf32> to vector<8x128xf32>
    %160 = arith.negf %159 : vector<8x128xf32>
    %161 = math.exp %160 : vector<8x128xf32>
    %cst_44 = arith.constant 1.000000e+00 : f32
    %162 = vector.broadcast %cst_44 : f32 to vector<8x128xf32>
    %163 = arith.addf %162, %161 : vector<8x128xf32>
    %164 = arith.divf %162, %163 : vector<8x128xf32>
    %165 = vector.extract_strided_slice %152 {offsets = [0, 256], sizes = [8, 128], strides = [1, 1]} : vector<8x512xf32> to vector<8x128xf32>
    %166 = math.tanh %165 : vector<8x128xf32>
    %167 = vector.extract_strided_slice %152 {offsets = [0, 384], sizes = [8, 128], strides = [1, 1]} : vector<8x512xf32> to vector<8x128xf32>
    %168 = arith.negf %167 : vector<8x128xf32>
    %169 = math.exp %168 : vector<8x128xf32>
    %cst_45 = arith.constant 1.000000e+00 : f32
    %170 = vector.broadcast %cst_45 : f32 to vector<8x128xf32>
    %171 = arith.addf %170, %169 : vector<8x128xf32>
    %172 = arith.divf %170, %171 : vector<8x128xf32>
    %173 = arith.mulf %164, %141 : vector<8x128xf32>
    %174 = arith.mulf %158, %166 : vector<8x128xf32>
    %175 = arith.addf %173, %174 : vector<8x128xf32>
    %176 = math.tanh %175 : vector<8x128xf32>
    %177 = arith.mulf %172, %176 : vector<8x128xf32>
    %c5_i32 = arith.constant 5 : i32
    %178 = arith.index_cast %c5_i32 : i32 to index
    %c0_46 = arith.constant 0 : index
    %c0_47 = arith.constant 0 : index
    %179 = vector.load %arg2[%178, %c0_46, %c0_47] : memref<8x8x512xbf16, #tpu.memory_space<vmem>>, vector<1x8x512xbf16>
    %180 = vector.shape_cast %179 : vector<1x8x512xbf16> to vector<8x512xbf16>
    %181 = arith.extf %180 : vector<8x512xbf16> to vector<8x512xf32>
    %182 = arith.addf %181, %5 : vector<8x512xf32>
    %183 = arith.truncf %177 : vector<8x128xf32> to vector<8x128xbf16>
    %c0_48 = arith.constant 0 : index
    %c0_49 = arith.constant 0 : index
    %184 = vector.load %arg3[%c0_48, %c0_49] : memref<128x512xbf16, #tpu.memory_space<vmem>>, vector<128x512xbf16>
    %cst_50 = arith.constant dense<0.000000e+00> : vector<8x512xf32>
    %185 = tpu.matmul %183, %184, %cst_50 {dimension_numbers = #tpu.dot_dimension_numbers<[1], [0], [0], [1], [0, 0, 1, 1], [], []>} : vector<8x128xbf16>, vector<128x512xbf16>, vector<8x512xf32> -> vector<8x512xf32>
    %186 = arith.addf %182, %185 : vector<8x512xf32>
    %187 = vector.extract_strided_slice %186 {offsets = [0, 0], sizes = [8, 128], strides = [1, 1]} : vector<8x512xf32> to vector<8x128xf32>
    %188 = arith.negf %187 : vector<8x128xf32>
    %189 = math.exp %188 : vector<8x128xf32>
    %cst_51 = arith.constant 1.000000e+00 : f32
    %190 = vector.broadcast %cst_51 : f32 to vector<8x128xf32>
    %191 = arith.addf %190, %189 : vector<8x128xf32>
    %192 = arith.divf %190, %191 : vector<8x128xf32>
    %193 = vector.extract_strided_slice %186 {offsets = [0, 128], sizes = [8, 128], strides = [1, 1]} : vector<8x512xf32> to vector<8x128xf32>
    %194 = arith.negf %193 : vector<8x128xf32>
    %195 = math.exp %194 : vector<8x128xf32>
    %cst_52 = arith.constant 1.000000e+00 : f32
    %196 = vector.broadcast %cst_52 : f32 to vector<8x128xf32>
    %197 = arith.addf %196, %195 : vector<8x128xf32>
    %198 = arith.divf %196, %197 : vector<8x128xf32>
    %199 = vector.extract_strided_slice %186 {offsets = [0, 256], sizes = [8, 128], strides = [1, 1]} : vector<8x512xf32> to vector<8x128xf32>
    %200 = math.tanh %199 : vector<8x128xf32>
    %201 = vector.extract_strided_slice %186 {offsets = [0, 384], sizes = [8, 128], strides = [1, 1]} : vector<8x512xf32> to vector<8x128xf32>
    %202 = arith.negf %201 : vector<8x128xf32>
    %203 = math.exp %202 : vector<8x128xf32>
    %cst_53 = arith.constant 1.000000e+00 : f32
    %204 = vector.broadcast %cst_53 : f32 to vector<8x128xf32>
    %205 = arith.addf %204, %203 : vector<8x128xf32>
    %206 = arith.divf %204, %205 : vector<8x128xf32>
    %207 = arith.mulf %198, %175 : vector<8x128xf32>
    %208 = arith.mulf %192, %200 : vector<8x128xf32>
    %209 = arith.addf %207, %208 : vector<8x128xf32>
    %210 = math.tanh %209 : vector<8x128xf32>
    %211 = arith.mulf %206, %210 : vector<8x128xf32>
    %c6_i32 = arith.constant 6 : i32
    %212 = arith.index_cast %c6_i32 : i32 to index
    %c0_54 = arith.constant 0 : index
    %c0_55 = arith.constant 0 : index
    %213 = vector.load %arg2[%212, %c0_54, %c0_55] : memref<8x8x512xbf16, #tpu.memory_space<vmem>>, vector<1x8x512xbf16>
    %214 = vector.shape_cast %213 : vector<1x8x512xbf16> to vector<8x512xbf16>
    %215 = arith.extf %214 : vector<8x512xbf16> to vector<8x512xf32>
    %216 = arith.addf %215, %5 : vector<8x512xf32>
    %217 = arith.truncf %211 : vector<8x128xf32> to vector<8x128xbf16>
    %c0_56 = arith.constant 0 : index
    %c0_57 = arith.constant 0 : index
    %218 = vector.load %arg3[%c0_56, %c0_57] : memref<128x512xbf16, #tpu.memory_space<vmem>>, vector<128x512xbf16>
    %cst_58 = arith.constant dense<0.000000e+00> : vector<8x512xf32>
    %219 = tpu.matmul %217, %218, %cst_58 {dimension_numbers = #tpu.dot_dimension_numbers<[1], [0], [0], [1], [0, 0, 1, 1], [], []>} : vector<8x128xbf16>, vector<128x512xbf16>, vector<8x512xf32> -> vector<8x512xf32>
    %220 = arith.addf %216, %219 : vector<8x512xf32>
    %221 = vector.extract_strided_slice %220 {offsets = [0, 0], sizes = [8, 128], strides = [1, 1]} : vector<8x512xf32> to vector<8x128xf32>
    %222 = arith.negf %221 : vector<8x128xf32>
    %223 = math.exp %222 : vector<8x128xf32>
    %cst_59 = arith.constant 1.000000e+00 : f32
    %224 = vector.broadcast %cst_59 : f32 to vector<8x128xf32>
    %225 = arith.addf %224, %223 : vector<8x128xf32>
    %226 = arith.divf %224, %225 : vector<8x128xf32>
    %227 = vector.extract_strided_slice %220 {offsets = [0, 128], sizes = [8, 128], strides = [1, 1]} : vector<8x512xf32> to vector<8x128xf32>
    %228 = arith.negf %227 : vector<8x128xf32>
    %229 = math.exp %228 : vector<8x128xf32>
    %cst_60 = arith.constant 1.000000e+00 : f32
    %230 = vector.broadcast %cst_60 : f32 to vector<8x128xf32>
    %231 = arith.addf %230, %229 : vector<8x128xf32>
    %232 = arith.divf %230, %231 : vector<8x128xf32>
    %233 = vector.extract_strided_slice %220 {offsets = [0, 256], sizes = [8, 128], strides = [1, 1]} : vector<8x512xf32> to vector<8x128xf32>
    %234 = math.tanh %233 : vector<8x128xf32>
    %235 = vector.extract_strided_slice %220 {offsets = [0, 384], sizes = [8, 128], strides = [1, 1]} : vector<8x512xf32> to vector<8x128xf32>
    %236 = arith.negf %235 : vector<8x128xf32>
    %237 = math.exp %236 : vector<8x128xf32>
    %cst_61 = arith.constant 1.000000e+00 : f32
    %238 = vector.broadcast %cst_61 : f32 to vector<8x128xf32>
    %239 = arith.addf %238, %237 : vector<8x128xf32>
    %240 = arith.divf %238, %239 : vector<8x128xf32>
    %241 = arith.mulf %232, %209 : vector<8x128xf32>
    %242 = arith.mulf %226, %234 : vector<8x128xf32>
    %243 = arith.addf %241, %242 : vector<8x128xf32>
    %244 = math.tanh %243 : vector<8x128xf32>
    %245 = arith.mulf %240, %244 : vector<8x128xf32>
    %c7_i32 = arith.constant 7 : i32
    %246 = arith.index_cast %c7_i32 : i32 to index
    %c0_62 = arith.constant 0 : index
    %c0_63 = arith.constant 0 : index
    %247 = vector.load %arg2[%246, %c0_62, %c0_63] : memref<8x8x512xbf16, #tpu.memory_space<vmem>>, vector<1x8x512xbf16>
    %248 = vector.shape_cast %247 : vector<1x8x512xbf16> to vector<8x512xbf16>
    %249 = arith.extf %248 : vector<8x512xbf16> to vector<8x512xf32>
    %250 = arith.addf %249, %5 : vector<8x512xf32>
    %251 = arith.truncf %245 : vector<8x128xf32> to vector<8x128xbf16>
    %c0_64 = arith.constant 0 : index
    %c0_65 = arith.constant 0 : index
    %252 = vector.load %arg3[%c0_64, %c0_65] : memref<128x512xbf16, #tpu.memory_space<vmem>>, vector<128x512xbf16>
    %cst_66 = arith.constant dense<0.000000e+00> : vector<8x512xf32>
    %253 = tpu.matmul %251, %252, %cst_66 {dimension_numbers = #tpu.dot_dimension_numbers<[1], [0], [0], [1], [0, 0, 1, 1], [], []>} : vector<8x128xbf16>, vector<128x512xbf16>, vector<8x512xf32> -> vector<8x512xf32>
    %254 = arith.addf %250, %253 : vector<8x512xf32>
    %255 = vector.extract_strided_slice %254 {offsets = [0, 0], sizes = [8, 128], strides = [1, 1]} : vector<8x512xf32> to vector<8x128xf32>
    %256 = arith.negf %255 : vector<8x128xf32>
    %257 = math.exp %256 : vector<8x128xf32>
    %cst_67 = arith.constant 1.000000e+00 : f32
    %258 = vector.broadcast %cst_67 : f32 to vector<8x128xf32>
    %259 = arith.addf %258, %257 : vector<8x128xf32>
    %260 = arith.divf %258, %259 : vector<8x128xf32>
    %261 = vector.extract_strided_slice %254 {offsets = [0, 128], sizes = [8, 128], strides = [1, 1]} : vector<8x512xf32> to vector<8x128xf32>
    %262 = arith.negf %261 : vector<8x128xf32>
    %263 = math.exp %262 : vector<8x128xf32>
    %cst_68 = arith.constant 1.000000e+00 : f32
    %264 = vector.broadcast %cst_68 : f32 to vector<8x128xf32>
    %265 = arith.addf %264, %263 : vector<8x128xf32>
    %266 = arith.divf %264, %265 : vector<8x128xf32>
    %267 = vector.extract_strided_slice %254 {offsets = [0, 256], sizes = [8, 128], strides = [1, 1]} : vector<8x512xf32> to vector<8x128xf32>
    %268 = math.tanh %267 : vector<8x128xf32>
    %269 = vector.extract_strided_slice %254 {offsets = [0, 384], sizes = [8, 128], strides = [1, 1]} : vector<8x512xf32> to vector<8x128xf32>
    %270 = arith.negf %269 : vector<8x128xf32>
    %271 = math.exp %270 : vector<8x128xf32>
    %cst_69 = arith.constant 1.000000e+00 : f32
    %272 = vector.broadcast %cst_69 : f32 to vector<8x128xf32>
    %273 = arith.addf %272, %271 : vector<8x128xf32>
    %274 = arith.divf %272, %273 : vector<8x128xf32>
    %275 = arith.mulf %266, %243 : vector<8x128xf32>
    %276 = arith.mulf %260, %268 : vector<8x128xf32>
    %277 = arith.addf %275, %276 : vector<8x128xf32>
    %278 = math.tanh %277 : vector<8x128xf32>
    %279 = arith.mulf %274, %278 : vector<8x128xf32>
    %c8_i32 = arith.constant 8 : i32
    %c0_70 = arith.constant 0 : index
    %c0_71 = arith.constant 0 : index
    %280 = vector.load %arg6[%c0_70, %c0_71] : memref<8x128xf32, #tpu.memory_space<vmem>>, vector<8x128xf32>
    tpu.vector_store %arg6[%c0_70, %c0_71], %279 {strides = array<i32>} : memref<8x128xf32, #tpu.memory_space<vmem>>, vector<8x128xf32>,
    %c0_72 = arith.constant 0 : index
    %c0_73 = arith.constant 0 : index
    %281 = vector.load %arg7[%c0_72, %c0_73] : memref<8x128xf32, #tpu.memory_space<vmem>>, vector<8x128xf32>
    tpu.vector_store %arg7[%c0_72, %c0_73], %277 {strides = array<i32>} : memref<8x128xf32, #tpu.memory_space<vmem>>, vector<8x128xf32>,
    %c0_i32_74 = arith.constant 0 : i32
    %282 = arith.cmpi eq, %arg1, %c0_i32_74 : i32
    %283 = arith.extui %282 : i1 to i32
    %c0_i32_75 = arith.constant 0 : i32
    %284 = arith.cmpi ne, %283, %c0_i32_75 : i32
    scf.if %284 {
      %c0_76 = arith.constant 0 : index
      %c0_77 = arith.constant 0 : index
      %285 = vector.load %arg5[%c0_76, %c0_77] : memref<8x128xf32, #tpu.memory_space<vmem>>, vector<8x128xf32>
      tpu.vector_store %arg5[%c0_76, %c0_77], %279 {strides = array<i32>} : memref<8x128xf32, #tpu.memory_space<vmem>>, vector<8x128xf32>,
    } else {
    }
    return
  }
  func.func @transform_0(%arg0: i32, %arg1: i32) -> (i32, i32, i32) {
    %c0_i32 = arith.constant 0 : i32
    %c0_i32_0 = arith.constant 0 : i32
    return %arg1, %arg0, %c0_i32 : i32, i32, i32
  }
  func.func @transform_1(%arg0: i32, %arg1: i32) -> (i32, i32) {
    %c0_i32 = arith.constant 0 : i32
    %c0_i32_0 = arith.constant 0 : i32
    %c0_i32_1 = arith.constant 0 : i32
    return %c0_i32, %c0_i32_0 : i32, i32
  }
  func.func @transform_2(%arg0: i32, %arg1: i32) -> (i32, i32) {
    %c0_i32 = arith.constant 0 : i32
    %c0_i32_0 = arith.constant 0 : i32
    %c0_i32_1 = arith.constant 0 : i32
    return %c0_i32, %c0_i32_0 : i32, i32
  }
  func.func @transform_3(%arg0: i32, %arg1: i32) -> (i32, i32) {
    %c0_i32 = arith.constant 0 : i32
    %c0_i32_0 = arith.constant 0 : i32
    return %arg0, %c0_i32 : i32, i32
  }
}

</mosaic_0001>

<bundles_post_ra>
// kernel: knowledge_augmented_lstm_forward.1
= control target key start
LH: loop header
LB: loop body
LE: loop exit
PB: predicated region body
PF: predicated region fallthrough
CT: control target
= control target key end

     0   :  { %v1502_v1 = vmov 0   ;;  %v1503_v33 = vmov 0.0|0.0   ;;  %v23_v34 = vlaneseq  ;;  %s2171_s1 = inlined_call_operand.vmem [shape: bf16[128,512], index: 1, kind: input, shape index: {}]   ;;  %s2172_s0 = inlined_call_operand.vmem [shape: bf16[8,8,512], index: 0, kind: input, shape index: {}]   ;;  %s2173_s2 = inlined_call_operand.vmem [shape: f32[1,512], index: 2, kind: input, shape index: {}]   ;;  %s2174_s3 = inlined_call_operand.vmem [shape: f32[8,128], index: 3, kind: output, shape index: {}]  }
   0x1   :  { %v1527_v0 = vld [vmem:[%s2171_s1 + $0x4] ss:$16 sps:$4 sm:$0xff]   ;;  %280 = vmatprep.mubr.bf16.mxu0 %v1502_v1  ;;  %321 = vmatprep.mubr.bf16.mxu1 %v1502_v1  ;;  %v1534_v2 = vld [vmem:[%s2171_s1] ss:$16 sps:$4 sm:$0xff]   ;;  %v1557_v6 = vld [vmem:[%s2171_s1 + $0xc] ss:$16 sps:$4 sm:$0xff]  }
   0x2   :  { %248 = vmatprep.subr.bf16.mxu0 %v1527_v0  ;;  %v1540_v3 = vld [vmem:[%s2171_s1 + $0x24] ss:$16 sps:$4 sm:$0xff]   ;;  %v1546_v4 = vld [vmem:[%s2171_s1 + $0x20] ss:$16 sps:$4 sm:$0xff]   ;;  %v1562_v7 = vld [vmem:[%s2171_s1 + $0x8] ss:$16 sps:$4 sm:$0xff]   ;;  %289 = vmatprep.subr.bf16.mxu1 %v1557_v6 }
   0x3   :  { %249 = vmatpush1.bf16.msra.mxu0 %v1534_v2  ;;  %v1552_v5 = vld [vmem:[%s2171_s1 + $0x44] ss:$16 sps:$4 sm:$0xff]   ;;  %v1568_v8 = vld [vmem:[%s2171_s1 + $0x40] ss:$16 sps:$4 sm:$0xff]   ;;  %290 = vmatpush1.bf16.msra.mxu1 %v1562_v7  ;;  %v1581_v10 = vld [vmem:[%s2171_s1 + $0x2c] ss:$16 sps:$4 sm:$0xff]  }
   0x4   :  { %250 = vmatprep.subr.bf16.mxu0 %v1540_v3  ;;  %v1575_v9 = vld [vmem:[%s2171_s1 + $0x64] ss:$16 sps:$4 sm:$0xff]   ;;  %v1586_v11 = vld [vmem:[%s2171_s1 + $0x28] ss:$16 sps:$4 sm:$0xff]   ;;  %291 = vmatprep.subr.bf16.mxu1 %v1581_v10  ;;  %v1593_v12 = vld [vmem:[%s2171_s1 + $0x60] ss:$16 sps:$4 sm:$0xff]  }
   0x5   :  { %v1598_v13 = vld [vmem:[%s2171_s1 + $0x84] ss:$16 sps:$4 sm:$0xff]   ;;  %v1603_v14 = vld [vmem:[%s2171_s1 + $0x4c] ss:$16 sps:$4 sm:$0xff]   ;;  %v1610_v15 = vld [vmem:[%s2171_s1 + $0x48] ss:$16 sps:$4 sm:$0xff]  }
   0x6   :  { %v1616_v16 = vld [vmem:[%s2171_s1 + $0x6c] ss:$16 sps:$4 sm:$0xff]   ;;  %v1622_v17 = vld [vmem:[%s2171_s1 + $0x80] ss:$16 sps:$4 sm:$0xff]   ;;  %v1628_v18 = vld [vmem:[%s2171_s1 + $0xa4] ss:$16 sps:$4 sm:$0xff]  }
   0x7   :  { %251 = vmatpush1.bf16.msra.mxu0 %v1546_v4  ;;  %292 = vmatpush1.bf16.msra.mxu1 %v1586_v11  ;;  %v1634_v19 = vld [vmem:[%s2171_s1 + $0x68] ss:$16 sps:$4 sm:$0xff]   ;;  %v1640_v20 = vld [vmem:[%s2171_s1 + $0x8c] ss:$16 sps:$4 sm:$0xff]   ;;  %v1646_v21 = vld [vmem:[%s2171_s1 + $0xa0] ss:$16 sps:$4 sm:$0xff]  }
   0x8   :  { %252 = vmatprep.subr.bf16.mxu0 %v1552_v5  ;;  %293 = vmatprep.subr.bf16.mxu1 %v1603_v14  ;;  %v1651_v22 = vld [vmem:[%s2171_s1 + $0xc4] ss:$16 sps:$4 sm:$0xff]   ;;  %v1658_v23 = vld [vmem:[%s2171_s1 + $0x88] ss:$16 sps:$4 sm:$0xff]   ;;  %v1664_v24 = vld [vmem:[%s2171_s1 + $0xac] ss:$16 sps:$4 sm:$0xff]  }
   0x9   :  { %v1670_v25 = vld [vmem:[%s2171_s1 + $0xc0] ss:$16 sps:$4 sm:$0xff]   ;;  %v1676_v26 = vld [vmem:[%s2171_s1 + $0xe4] ss:$16 sps:$4 sm:$0xff]   ;;  %v1682_v27 = vld [vmem:[%s2171_s1 + $0xa8] ss:$16 sps:$4 sm:$0xff]  }
   0xa   :  { %v1688_v28 = vld [vmem:[%s2171_s1 + $0xcc] ss:$16 sps:$4 sm:$0xff]   ;;  %v1694_v29 = vld [vmem:[%s2171_s1 + $0xe0] ss:$16 sps:$4 sm:$0xff]   ;;  %v1701_v30 = vld [vmem:[%s2171_s1 + $0xc8] ss:$16 sps:$4 sm:$0xff]  }
   0xb   :  { %253 = vmatpush1.bf16.msra.mxu0 %v1568_v8  ;;  %294 = vmatpush1.bf16.msra.mxu1 %v1610_v15  ;;  %v1707_v31 = vld [vmem:[%s2171_s1 + $0xec] ss:$16 sps:$4 sm:$0xff]   ;;  %v1714_v32 = vld [vmem:[%s2171_s1 + $0xe8] ss:$16 sps:$4 sm:$0xff]   ;;  %v24_v35 = vshrl.u32 %v23_v34, 7  ;;  %v45_v38 = vld [vmem:[%s2172_s0] sm:$0xff] }
   0xc   :  { %254 = vmatprep.subr.bf16.mxu0 %v1575_v9  ;;  %295 = vmatprep.subr.bf16.mxu1 %v1616_v16  ;;  %v21_v37 = vld [vmem:[%s2173_s2] sm:$0xf]  ;;  %v47_v41 = vunpack.c.l.bf16 %v45_v38  ;;  %v48_v43 = vunpack.c.h.bf16 %v45_v38  ;;  %v46_v45 = vld [vmem:[%s2172_s0 + $0x8] sm:$0xff] }
   0xd   :  { %v25_v36 = vsub.s32 0, %v24_v35  ;;  %v29_v39 = vsub.s32 1, %v24_v35  ;;  %v37_v44 = vsub.s32 3, %v24_v35  ;;  %v50_v49 = vunpack.c.h.bf16 %v46_v45 }
   0xe   :  { %v33_v51 = vsub.s32 2, %v24_v35  ;;  %v49_v61 = vunpack.c.l.bf16 %v46_v45 }
   0xf   :  { %255 = vmatpush1.bf16.msra.mxu0 %v1593_v12  ;;  %296 = vmatpush1.bf16.msra.mxu1 %v1634_v19  ;;  %v1760_v40 = vrot.slane %v21_v37, %v25_v36  ;;  %v1762_v42 = vrot.slane %v21_v37, %v29_v39  ;;  %v1769_v48 = vrot.slane %v21_v37, %v37_v44 }
  0x10   :  { %256 = vmatprep.subr.bf16.mxu0 %v1598_v13  ;;  %297 = vmatprep.subr.bf16.mxu1 %v1640_v20  ;;  %v1772_v60 = vrot.slane %v21_v37, %v33_v51 }
  0x11   :  { %v51_v46 = vadd.f32 %v47_v41, %v1760_v40  ;;  %v52_v47 = vadd.f32 %v48_v43, %v1762_v42  ;;  %v54_v58 = vadd.f32 %v50_v49, %v1769_v48 }
  0x12   :  { %v53_v35 = vadd.f32 %v49_v61, %v1772_v60 }
  0x13   :  { %257 = vmatpush1.bf16.msra.mxu0 %v1622_v17  ;;  %298 = vmatpush1.bf16.msra.mxu1 %v1658_v23 }
  0x14   :  { %258 = vmatprep.subr.bf16.mxu0 %v1628_v18  ;;  %299 = vmatprep.subr.bf16.mxu1 %v1664_v24 }
  0x17   :  { %259 = vmatpush1.bf16.msra.mxu0 %v1646_v21  ;;  %300 = vmatpush1.bf16.msra.mxu1 %v1682_v27 }
  0x18   :  { %260 = vmatprep.subr.bf16.mxu0 %v1651_v22  ;;  %301 = vmatprep.subr.bf16.mxu1 %v1688_v28 }
  0x1b   :  { %261 = vmatpush1.bf16.msra.mxu0 %v1670_v25  ;;  %302 = vmatpush1.bf16.msra.mxu1 %v1701_v30 }
  0x1c   :  { %262 = vmatprep.subr.bf16.mxu0 %v1676_v26  ;;  %303 = vmatprep.subr.bf16.mxu1 %v1707_v31 }
  0x1f   :  { %263 = vmatpush1.bf16.msra.mxu0 %v1694_v29  ;;  %304 = vmatpush1.bf16.msra.mxu1 %v1714_v32 }
  0x20   :  { %370 = vmatprep.subr.bf16.mxu0 %v1527_v0  ;;  %411 = vmatprep.subr.bf16.mxu1 %v1557_v6 }
  0x22   :  { %281 = vmatmul.mubr.bf16.vlgmr.msra.gmra.mrb[0].mxu0 %v1503_v33  ;;  %322 = vmatmul.mubr.bf16.vlgmr.msra.gmra.mrb[0].mxu1 %v1503_v33 }
  0x23   :  { %371 = vmatpush1.bf16.msra.mxu0 %v1534_v2  ;;  %402 = vmatprep.mubr.bf16.mxu0 %v1502_v1 }
  0x24   :  { %372 = vmatprep.subr.bf16.mxu0 %v1540_v3  ;;  %412 = vmatpush1.bf16.msra.mxu1 %v1562_v7 }
  0x25   :  { %413 = vmatprep.subr.bf16.mxu1 %v1581_v10  ;;  %443 = vmatprep.mubr.bf16.mxu1 %v1502_v1 }
  0x27   :  { %373 = vmatpush1.bf16.msra.mxu0 %v1546_v4 }
  0x28   :  { %374 = vmatprep.subr.bf16.mxu0 %v1552_v5  ;;  %414 = vmatpush1.bf16.msra.mxu1 %v1586_v11 }
  0x29   :  { %415 = vmatprep.subr.bf16.mxu1 %v1603_v14 }
  0x2b   :  { %375 = vmatpush1.bf16.msra.mxu0 %v1568_v8 }
  0x2c   :  { %376 = vmatprep.subr.bf16.mxu0 %v1575_v9  ;;  %416 = vmatpush1.bf16.msra.mxu1 %v1610_v15 }
  0x2d   :  { %417 = vmatprep.subr.bf16.mxu1 %v1616_v16 }
  0x2f   :  { %377 = vmatpush1.bf16.msra.mxu0 %v1593_v12 }
  0x30   :  { %378 = vmatprep.subr.bf16.mxu0 %v1598_v13  ;;  %418 = vmatpush1.bf16.msra.mxu1 %v1634_v19 }
  0x31   :  { %419 = vmatprep.subr.bf16.mxu1 %v1640_v20 }
  0x33   :  { %379 = vmatpush1.bf16.msra.mxu0 %v1622_v17 }
  0x34   :  { %380 = vmatprep.subr.bf16.mxu0 %v1628_v18  ;;  %420 = vmatpush1.bf16.msra.mxu1 %v1658_v23 }
  0x35   :  { %421 = vmatprep.subr.bf16.mxu1 %v1664_v24 }
  0x37   :  { %381 = vmatpush1.bf16.msra.mxu0 %v1646_v21 }
  0x38   :  { %382 = vmatprep.subr.bf16.mxu0 %v1651_v22  ;;  %422 = vmatpush1.bf16.msra.mxu1 %v1682_v27 }
  0x39   :  { %423 = vmatprep.subr.bf16.mxu1 %v1688_v28 }
  0x3b   :  { %383 = vmatpush1.bf16.msra.mxu0 %v1670_v25 }
  0x3c   :  { %384 = vmatprep.subr.bf16.mxu0 %v1676_v26  ;;  %424 = vmatpush1.bf16.msra.mxu1 %v1701_v30 }
  0x3d   :  { %425 = vmatprep.subr.bf16.mxu1 %v1707_v31 }
  0x3f   :  { %385 = vmatpush1.bf16.msra.mxu0 %v1694_v29 }
  0x40   :  { %492 = vmatprep.subr.bf16.mxu0 %v1527_v0  ;;  %426 = vmatpush1.bf16.msra.mxu1 %v1714_v32 }
  0x41   :  { %533 = vmatprep.subr.bf16.mxu1 %v1557_v6 }
  0xf5   :  { %v282_v50 = vpop.f32.mrb[0].mxu0  ;;  %v323_v62 = vpop.f32.mrb[0].mxu1 }
  0xf6   :  { %v330_v52 = vadd.f32 %v282_v50, %v51_v46  ;;  %v284_v53 = vpop.f32.mrb[1].mxu0  ;;  %v325_v63 = vpop.f32.mrb[1].mxu1  ;;  %v332_v39 = vadd.f32 %v323_v62, %v53_v35 }
  0xf7   :  { %v331_v54 = vadd.f32 %v284_v53, %v52_v47  ;;  %v286_v55 = vpop.f32.mrb[2].mxu0  ;;  %v333_v33 = vadd.f32 %v325_v63, %v54_v58  ;;  %v327_v34 = vpop.f32.mrb[2].mxu1  ;;  %v1257_v58 = vld [vmem:[%s2172_s0 + $0x10] sm:$0xff]  ;;  %v1258_v63 = vld [vmem:[%s2172_s0 + $0x18] sm:$0xff] }
  0xf8   :  { %v1254_v56 = vmul.f32 -1.442695, %v330_v52  ;;  %v287_v57 = vpop.f32.mrb[3].mxu0  ;;  %v328_v36 = vpop.f32.mrb[3].mxu1  ;;  %v362_v61 = vunpack.c.h.bf16 %v1257_v58 }
  0xf9   :  { %v1255_v59 = vmul.f32 -1.442695, %v331_v54  ;;  %v1256_v38 = vmul.f32 -1.442695, %v333_v33  ;;  %v364_v36 = vunpack.c.h.bf16 %v1258_v63 }
  0xfa   :  { %1342 = vpow2.f32 %v1254_v56  ;;  %v366_v33 = vadd.f32 %v362_v61, %v1762_v42 }
  0xfb   :  { %1344 = vpow2.f32 %v1255_v59  ;;  %v361_v59 = vunpack.c.l.bf16 %v1257_v58 }
  0xfc   :  { %1346 = vpow2.f32 %v1256_v38 }
  0xfd   :  { %1348 = vtanh.f32 %v332_v39  ;;  %v365_v62 = vadd.f32 %v361_v59, %v1760_v40 }
 0x104   :  { %v1343_v41 = vpop.eup %1342 }
 0x105   :  { %v1345_v43 = vpop.eup %1344  ;;  %v337_v44 = vadd.f32 1.0, %v1343_v41 }
 0x106   :  { %v343_v46 = vadd.f32 1.0, %v1345_v43  ;;  %v1347_v37 = vpop.eup %1346 }
 0x107   :  { %1350 = vrcp.f32 %v337_v44  ;;  %v1349_v45 = vpop.eup %1348  ;;  %v350_v49 = vadd.f32 1.0, %v1347_v37 }
 0x108   :  { %1352 = vrcp.f32 %v343_v46 }
 0x109   :  { %1354 = vrcp.f32 %v350_v49 }
 0x111   :  { %v1351_v47 = vpop.eup %1350 }
 0x112   :  { %v1353_v50 = vpop.eup %1352  ;;  %v354_v51 = vmul.f32 %v1351_v47, %v1349_v45 }
 0x113   :  { %v353_v52 = vmul.f32 0.0, %v1353_v50  ;;  %v1355_v54 = vpop.eup %1354  ;;  %v368_v50 = vadd.f32 %v364_v36, %v1769_v48 }
 0x115   :  { %v1775_v53 = vadd.f32 %v354_v51, %v353_v52  ;;  %v363_v51 = vunpack.c.l.bf16 %v1258_v63 }
 0x117   :  { %1356 = vtanh.f32 %v1775_v53 }
 0x121   :  { %v1357_v55 = vpop.eup %1356 }
 0x122   :  { %v357_v56 = vmul.f32 %v1357_v55, %v1355_v54  ;;  %v367_v54 = vadd.f32 %v363_v51, %v1772_v60 }
 0x124   :  { %v369_v57 = vpack.c.bf16 %v357_v56, %v357_v56 }
 0x126   :  { %403 = vmatmul.mubr.bf16.vlgmr.msra.gmra.mrb[4].mxu0 %v369_v57  ;;  %444 = vmatmul.mubr.bf16.vlgmr.msra.gmra.mrb[4].mxu1 %v369_v57 }
 0x127   :  { %493 = vmatpush1.bf16.msra.mxu0 %v1534_v2  ;;  %534 = vmatpush1.bf16.msra.mxu1 %v1562_v7 }
 0x128   :  { %494 = vmatprep.subr.bf16.mxu0 %v1540_v3  ;;  %535 = vmatprep.subr.bf16.mxu1 %v1581_v10 }
 0x129   :  { %524 = vmatprep.mubr.bf16.mxu0 %v1502_v1  ;;  %565 = vmatprep.mubr.bf16.mxu1 %v1502_v1 }
 0x12b   :  { %495 = vmatpush1.bf16.msra.mxu0 %v1546_v4  ;;  %536 = vmatpush1.bf16.msra.mxu1 %v1586_v11 }
 0x12c   :  { %496 = vmatprep.subr.bf16.mxu0 %v1552_v5  ;;  %537 = vmatprep.subr.bf16.mxu1 %v1603_v14 }
 0x12f   :  { %497 = vmatpush1.bf16.msra.mxu0 %v1568_v8  ;;  %538 = vmatpush1.bf16.msra.mxu1 %v1610_v15 }
 0x130   :  { %498 = vmatprep.subr.bf16.mxu0 %v1575_v9  ;;  %539 = vmatprep.subr.bf16.mxu1 %v1616_v16 }
 0x133   :  { %499 = vmatpush1.bf16.msra.mxu0 %v1593_v12  ;;  %540 = vmatpush1.bf16.msra.mxu1 %v1634_v19 }
 0x134   :  { %500 = vmatprep.subr.bf16.mxu0 %v1598_v13  ;;  %541 = vmatprep.subr.bf16.mxu1 %v1640_v20 }
 0x137   :  { %501 = vmatpush1.bf16.msra.mxu0 %v1622_v17  ;;  %542 = vmatpush1.bf16.msra.mxu1 %v1658_v23 }
 0x138   :  { %502 = vmatprep.subr.bf16.mxu0 %v1628_v18  ;;  %543 = vmatprep.subr.bf16.mxu1 %v1664_v24 }
 0x13b   :  { %503 = vmatpush1.bf16.msra.mxu0 %v1646_v21  ;;  %544 = vmatpush1.bf16.msra.mxu1 %v1682_v27 }
 0x13c   :  { %504 = vmatprep.subr.bf16.mxu0 %v1651_v22  ;;  %545 = vmatprep.subr.bf16.mxu1 %v1688_v28 }
 0x13f   :  { %505 = vmatpush1.bf16.msra.mxu0 %v1670_v25  ;;  %546 = vmatpush1.bf16.msra.mxu1 %v1701_v30 }
 0x140   :  { %506 = vmatprep.subr.bf16.mxu0 %v1676_v26  ;;  %547 = vmatprep.subr.bf16.mxu1 %v1707_v31 }
 0x143   :  { %507 = vmatpush1.bf16.msra.mxu0 %v1694_v29  ;;  %548 = vmatpush1.bf16.msra.mxu1 %v1714_v32 }
 0x144   :  { %614 = vmatprep.subr.bf16.mxu0 %v1527_v0  ;;  %655 = vmatprep.subr.bf16.mxu1 %v1557_v6 }
 0x1f9   :  { %v404_v34 = vpop.f32.mrb[4].mxu0  ;;  %v445_v35 = vpop.f32.mrb[4].mxu1 }
 0x1fa   :  { %v452_v38 = vadd.f32 %v404_v34, %v365_v62  ;;  %v406_v39 = vpop.f32.mrb[5].mxu0  ;;  %v447_v41 = vpop.f32.mrb[5].mxu1  ;;  %v454_v56 = vadd.f32 %v445_v35, %v367_v54 }
 0x1fb   :  { %v453_v43 = vadd.f32 %v406_v39, %v366_v33  ;;  %v408_v44 = vpop.f32.mrb[6].mxu0  ;;  %v449_v46 = vpop.f32.mrb[6].mxu1  ;;  %v455_v52 = vadd.f32 %v447_v41, %v368_v50 }
 0x1fc   :  { %v1259_v37 = vmul.f32 -1.442695, %v452_v38  ;;  %v409_v45 = vpop.f32.mrb[7].mxu0  ;;  %v450_v47 = vpop.f32.mrb[7].mxu1 }
 0x1fd   :  { %v1260_v49 = vmul.f32 -1.442695, %v453_v43  ;;  %v1261_v55 = vmul.f32 -1.442695, %v455_v52 }
 0x1fe   :  { %1358 = vpow2.f32 %v1259_v37 }
 0x1ff   :  { %1360 = vpow2.f32 %v1260_v49  ;;  %v1263_v49 = vld [vmem:[%s2172_s0 + $0x28] sm:$0xff] }
 0x200   :  { %1362 = vpow2.f32 %v1261_v55  ;;  %v486_v54 = vunpack.c.h.bf16 %v1263_v49 }
 0x201   :  { %1364 = vtanh.f32 %v454_v56 }
 0x208   :  { %v1359_v57 = vpop.eup %1358 }
 0x209   :  { %v1361_v58 = vpop.eup %1360  ;;  %v459_v59 = vadd.f32 1.0, %v1359_v57 }
 0x20a   :  { %v465_v61 = vadd.f32 1.0, %v1361_v58  ;;  %v1363_v62 = vpop.eup %1362 }
 0x20b   :  { %1366 = vrcp.f32 %v459_v59  ;;  %v1365_v33 = vpop.eup %1364  ;;  %v472_v63 = vadd.f32 1.0, %v1363_v62 }
 0x20c   :  { %1368 = vrcp.f32 %v465_v61 }
 0x20d   :  { %1370 = vrcp.f32 %v472_v63  ;;  %v485_v63 = vunpack.c.l.bf16 %v1263_v49 }
 0x215   :  { %v1367_v34 = vpop.eup %1366 }
 0x216   :  { %v1369_v36 = vpop.eup %1368  ;;  %v476_v38 = vmul.f32 %v1367_v34, %v1365_v33 }
 0x217   :  { %v475_v39 = vmul.f32 %v1369_v36, %v1775_v53  ;;  %v1371_v35 = vpop.eup %1370  ;;  %v1262_v53 = vld [vmem:[%s2172_s0 + $0x20] sm:$0xff] }
 0x218   :  { %v483_v37 = vunpack.c.l.bf16 %v1262_v53  ;;  %v484_v45 = vunpack.c.h.bf16 %v1262_v53 }
 0x219   :  { %v1823_v41 = vadd.f32 %v476_v38, %v475_v39  ;;  %v490_v38 = vadd.f32 %v486_v54, %v1769_v48 }
 0x21a   :  { %v487_v47 = vadd.f32 %v483_v37, %v1760_v40  ;;  %v488_v50 = vadd.f32 %v484_v45, %v1762_v42 }
 0x21b   :  { %1372 = vtanh.f32 %v1823_v41 }
 0x225   :  { %v1373_v43 = vpop.eup %1372 }
 0x226   :  { %v479_v44 = vmul.f32 %v1373_v43, %v1371_v35  ;;  %v489_v35 = vadd.f32 %v485_v63, %v1772_v60 }
 0x228   :  { %v491_v46 = vpack.c.bf16 %v479_v44, %v479_v44 }
 0x22a   :  { %525 = vmatmul.mubr.bf16.vlgmr.msra.gmra.mrb[8].mxu0 %v491_v46  ;;  %566 = vmatmul.mubr.bf16.vlgmr.msra.gmra.mrb[8].mxu1 %v491_v46 }
 0x22b   :  { %615 = vmatpush1.bf16.msra.mxu0 %v1534_v2  ;;  %656 = vmatpush1.bf16.msra.mxu1 %v1562_v7 }
 0x22c   :  { %616 = vmatprep.subr.bf16.mxu0 %v1540_v3  ;;  %657 = vmatprep.subr.bf16.mxu1 %v1581_v10 }
 0x22d   :  { %646 = vmatprep.mubr.bf16.mxu0 %v1502_v1  ;;  %687 = vmatprep.mubr.bf16.mxu1 %v1502_v1 }
 0x22f   :  { %617 = vmatpush1.bf16.msra.mxu0 %v1546_v4  ;;  %658 = vmatpush1.bf16.msra.mxu1 %v1586_v11 }
 0x230   :  { %618 = vmatprep.subr.bf16.mxu0 %v1552_v5  ;;  %659 = vmatprep.subr.bf16.mxu1 %v1603_v14 }
 0x233   :  { %619 = vmatpush1.bf16.msra.mxu0 %v1568_v8  ;;  %660 = vmatpush1.bf16.msra.mxu1 %v1610_v15 }
 0x234   :  { %620 = vmatprep.subr.bf16.mxu0 %v1575_v9  ;;  %661 = vmatprep.subr.bf16.mxu1 %v1616_v16 }
 0x237   :  { %621 = vmatpush1.bf16.msra.mxu0 %v1593_v12  ;;  %662 = vmatpush1.bf16.msra.mxu1 %v1634_v19 }
 0x238   :  { %622 = vmatprep.subr.bf16.mxu0 %v1598_v13  ;;  %663 = vmatprep.subr.bf16.mxu1 %v1640_v20 }
 0x23b   :  { %623 = vmatpush1.bf16.msra.mxu0 %v1622_v17  ;;  %664 = vmatpush1.bf16.msra.mxu1 %v1658_v23 }
 0x23c   :  { %624 = vmatprep.subr.bf16.mxu0 %v1628_v18  ;;  %665 = vmatprep.subr.bf16.mxu1 %v1664_v24 }
 0x23f   :  { %625 = vmatpush1.bf16.msra.mxu0 %v1646_v21  ;;  %666 = vmatpush1.bf16.msra.mxu1 %v1682_v27 }
 0x240   :  { %626 = vmatprep.subr.bf16.mxu0 %v1651_v22  ;;  %667 = vmatprep.subr.bf16.mxu1 %v1688_v28 }
 0x243   :  { %627 = vmatpush1.bf16.msra.mxu0 %v1670_v25  ;;  %668 = vmatpush1.bf16.msra.mxu1 %v1701_v30 }
 0x244   :  { %628 = vmatprep.subr.bf16.mxu0 %v1676_v26  ;;  %669 = vmatprep.subr.bf16.mxu1 %v1707_v31 }
 0x247   :  { %629 = vmatpush1.bf16.msra.mxu0 %v1694_v29  ;;  %670 = vmatpush1.bf16.msra.mxu1 %v1714_v32 }
 0x248   :  { %736 = vmatprep.subr.bf16.mxu0 %v1527_v0  ;;  %777 = vmatprep.subr.bf16.mxu1 %v1557_v6 }
 0x2fd   :  { %v526_v51 = vpop.f32.mrb[8].mxu0  ;;  %v567_v52 = vpop.f32.mrb[8].mxu1 }
 0x2fe   :  { %v574_v55 = vadd.f32 %v526_v51, %v487_v47  ;;  %v528_v56 = vpop.f32.mrb[9].mxu0  ;;  %v569_v57 = vpop.f32.mrb[9].mxu1  ;;  %v576_v44 = vadd.f32 %v567_v52, %v489_v35 }
 0x2ff   :  { %v575_v58 = vadd.f32 %v528_v56, %v488_v50  ;;  %v530_v59 = vpop.f32.mrb[10].mxu0  ;;  %v571_v61 = vpop.f32.mrb[10].mxu1  ;;  %v577_v39 = vadd.f32 %v569_v57, %v490_v38 }
 0x300   :  { %v1264_v62 = vmul.f32 -1.442695, %v574_v55  ;;  %v531_v33 = vpop.f32.mrb[11].mxu0  ;;  %v572_v34 = vpop.f32.mrb[11].mxu1 }
 0x301   :  { %v1265_v36 = vmul.f32 -1.442695, %v575_v58  ;;  %v1266_v43 = vmul.f32 -1.442695, %v577_v39 }
 0x302   :  { %1374 = vpow2.f32 %v1264_v62 }
 0x303   :  { %1376 = vpow2.f32 %v1265_v36  ;;  %v1268_v36 = vld [vmem:[%s2172_s0 + $0x38] sm:$0xff] }
 0x304   :  { %1378 = vpow2.f32 %v1266_v43  ;;  %v608_v35 = vunpack.c.h.bf16 %v1268_v36 }
 0x305   :  { %1380 = vtanh.f32 %v576_v44 }
 0x30c   :  { %v1375_v46 = vpop.eup %1374 }
 0x30d   :  { %v1377_v53 = vpop.eup %1376  ;;  %v581_v37 = vadd.f32 1.0, %v1375_v46 }
 0x30e   :  { %v587_v45 = vadd.f32 1.0, %v1377_v53  ;;  %v1379_v47 = vpop.eup %1378 }
 0x30f   :  { %1382 = vrcp.f32 %v581_v37  ;;  %v1381_v50 = vpop.eup %1380  ;;  %v594_v49 = vadd.f32 1.0, %v1379_v47 }
 0x310   :  { %1384 = vrcp.f32 %v587_v45 }
 0x311   :  { %1386 = vrcp.f32 %v594_v49  ;;  %v607_v49 = vunpack.c.l.bf16 %v1268_v36 }
 0x319   :  { %v1383_v51 = vpop.eup %1382 }
 0x31a   :  { %v1385_v54 = vpop.eup %1384  ;;  %v598_v55 = vmul.f32 %v1383_v51, %v1381_v50 }
 0x31b   :  { %v597_v56 = vmul.f32 %v1385_v54, %v1823_v41  ;;  %v1387_v52 = vpop.eup %1386  ;;  %v1267_v41 = vld [vmem:[%s2172_s0 + $0x30] sm:$0xff] }
 0x31c   :  { %v605_v62 = vunpack.c.l.bf16 %v1267_v41  ;;  %v606_v33 = vunpack.c.h.bf16 %v1267_v41 }
 0x31d   :  { %v1871_v57 = vadd.f32 %v598_v55, %v597_v56  ;;  %v612_v55 = vadd.f32 %v608_v35, %v1769_v48 }
 0x31e   :  { %v609_v34 = vadd.f32 %v605_v62, %v1760_v40  ;;  %v610_v38 = vadd.f32 %v606_v33, %v1762_v42 }
 0x31f   :  { %1388 = vtanh.f32 %v1871_v57 }
 0x329   :  { %v1389_v58 = vpop.eup %1388 }
 0x32a   :  { %v601_v59 = vmul.f32 %v1389_v58, %v1387_v52  ;;  %v611_v52 = vadd.f32 %v607_v49, %v1772_v60 }
 0x32c   :  { %v613_v61 = vpack.c.bf16 %v601_v59, %v601_v59 }
 0x32e   :  { %647 = vmatmul.mubr.bf16.vlgmr.msra.gmra.mrb[12].mxu0 %v613_v61  ;;  %688 = vmatmul.mubr.bf16.vlgmr.msra.gmra.mrb[12].mxu1 %v613_v61 }
 0x32f   :  { %737 = vmatpush1.bf16.msra.mxu0 %v1534_v2  ;;  %778 = vmatpush1.bf16.msra.mxu1 %v1562_v7 }
 0x330   :  { %738 = vmatprep.subr.bf16.mxu0 %v1540_v3  ;;  %779 = vmatprep.subr.bf16.mxu1 %v1581_v10 }
 0x331   :  { %768 = vmatprep.mubr.bf16.mxu0 %v1502_v1  ;;  %809 = vmatprep.mubr.bf16.mxu1 %v1502_v1 }
 0x333   :  { %739 = vmatpush1.bf16.msra.mxu0 %v1546_v4  ;;  %780 = vmatpush1.bf16.msra.mxu1 %v1586_v11 }
 0x334   :  { %740 = vmatprep.subr.bf16.mxu0 %v1552_v5  ;;  %781 = vmatprep.subr.bf16.mxu1 %v1603_v14 }
 0x337   :  { %741 = vmatpush1.bf16.msra.mxu0 %v1568_v8  ;;  %782 = vmatpush1.bf16.msra.mxu1 %v1610_v15 }
 0x338   :  { %742 = vmatprep.subr.bf16.mxu0 %v1575_v9  ;;  %783 = vmatprep.subr.bf16.mxu1 %v1616_v16 }
 0x33b   :  { %743 = vmatpush1.bf16.msra.mxu0 %v1593_v12  ;;  %784 = vmatpush1.bf16.msra.mxu1 %v1634_v19 }
 0x33c   :  { %744 = vmatprep.subr.bf16.mxu0 %v1598_v13  ;;  %785 = vmatprep.subr.bf16.mxu1 %v1640_v20 }
 0x33f   :  { %745 = vmatpush1.bf16.msra.mxu0 %v1622_v17  ;;  %786 = vmatpush1.bf16.msra.mxu1 %v1658_v23 }
 0x340   :  { %746 = vmatprep.subr.bf16.mxu0 %v1628_v18  ;;  %787 = vmatprep.subr.bf16.mxu1 %v1664_v24 }
 0x343   :  { %747 = vmatpush1.bf16.msra.mxu0 %v1646_v21  ;;  %788 = vmatpush1.bf16.msra.mxu1 %v1682_v27 }
 0x344   :  { %748 = vmatprep.subr.bf16.mxu0 %v1651_v22  ;;  %789 = vmatprep.subr.bf16.mxu1 %v1688_v28 }
 0x347   :  { %749 = vmatpush1.bf16.msra.mxu0 %v1670_v25  ;;  %790 = vmatpush1.bf16.msra.mxu1 %v1701_v30 }
 0x348   :  { %750 = vmatprep.subr.bf16.mxu0 %v1676_v26  ;;  %791 = vmatprep.subr.bf16.mxu1 %v1707_v31 }
 0x34b   :  { %751 = vmatpush1.bf16.msra.mxu0 %v1694_v29  ;;  %792 = vmatpush1.bf16.msra.mxu1 %v1714_v32 }
 0x34c   :  { %858 = vmatprep.subr.bf16.mxu0 %v1527_v0  ;;  %899 = vmatprep.subr.bf16.mxu1 %v1557_v6 }
 0x401   :  { %v648_v63 = vpop.f32.mrb[12].mxu0  ;;  %v689_v39 = vpop.f32.mrb[12].mxu1 }
 0x402   :  { %v696_v43 = vadd.f32 %v648_v63, %v609_v34  ;;  %v650_v44 = vpop.f32.mrb[13].mxu0  ;;  %v691_v46 = vpop.f32.mrb[13].mxu1  ;;  %v698_v59 = vadd.f32 %v689_v39, %v611_v52 }
 0x403   :  { %v697_v53 = vadd.f32 %v650_v44, %v610_v38  ;;  %v652_v37 = vpop.f32.mrb[14].mxu0  ;;  %v693_v45 = vpop.f32.mrb[14].mxu1  ;;  %v699_v56 = vadd.f32 %v691_v46, %v612_v55 }
 0x404   :  { %v1269_v47 = vmul.f32 -1.442695, %v696_v43  ;;  %v653_v50 = vpop.f32.mrb[15].mxu0  ;;  %v694_v51 = vpop.f32.mrb[15].mxu1 }
 0x405   :  { %v1270_v54 = vmul.f32 -1.442695, %v697_v53  ;;  %v1271_v58 = vmul.f32 -1.442695, %v699_v56 }
 0x406   :  { %1390 = vpow2.f32 %v1269_v47 }
 0x407   :  { %1392 = vpow2.f32 %v1270_v54 }
 0x408   :  { %1394 = vpow2.f32 %v1271_v58 }
 0x409   :  { %1396 = vtanh.f32 %v698_v59 }
 0x410   :  { %v1391_v61 = vpop.eup %1390 }
 0x411   :  { %v1393_v41 = vpop.eup %1392  ;;  %v703_v62 = vadd.f32 1.0, %v1391_v61 }
 0x412   :  { %v709_v33 = vadd.f32 1.0, %v1393_v41  ;;  %v1395_v34 = vpop.eup %1394 }
 0x413   :  { %1398 = vrcp.f32 %v703_v62  ;;  %v1397_v38 = vpop.eup %1396  ;;  %v716_v36 = vadd.f32 1.0, %v1395_v34 }
 0x414   :  { %1400 = vrcp.f32 %v709_v33 }
 0x415   :  { %1402 = vrcp.f32 %v716_v36 }
 0x41d   :  { %v1399_v63 = vpop.eup %1398 }
 0x41e   :  { %v1401_v35 = vpop.eup %1400  ;;  %v720_v43 = vmul.f32 %v1399_v63, %v1397_v38 }
 0x41f   :  { %v719_v44 = vmul.f32 %v1401_v35, %v1871_v57  ;;  %v1403_v39 = vpop.eup %1402 }
 0x421   :  { %v1919_v46 = vadd.f32 %v720_v43, %v719_v44 }
 0x423   :  { %1404 = vtanh.f32 %v1919_v46 }
 0x42d   :  { %v1405_v53 = vpop.eup %1404 }
 0x42e   :  { %v723_v37 = vmul.f32 %v1405_v53, %v1403_v39 }
 0x430   :  { %v735_v45 = vpack.c.bf16 %v723_v37, %v723_v37 }
 0x432   :  { %769 = vmatmul.mubr.bf16.vlgmr.msra.gmra.mrb[16].mxu0 %v735_v45  ;;  %810 = vmatmul.mubr.bf16.vlgmr.msra.gmra.mrb[16].mxu1 %v735_v45 }
 0x433   :  { %859 = vmatpush1.bf16.msra.mxu0 %v1534_v2  ;;  %900 = vmatpush1.bf16.msra.mxu1 %v1562_v7  ;;  %v1272_v2 = vld [vmem:[%s2172_s0 + $0x40] sm:$0xff]  ;;  %v1273_v7 = vld [vmem:[%s2172_s0 + $0x48] sm:$0xff] }
 0x434   :  { %860 = vmatprep.subr.bf16.mxu0 %v1540_v3  ;;  %901 = vmatprep.subr.bf16.mxu1 %v1581_v10  ;;  %v727_v3 = vunpack.c.l.bf16 %v1272_v2  ;;  %v729_v56 = vunpack.c.l.bf16 %v1273_v7 }
 0x435   :  { %890 = vmatprep.mubr.bf16.mxu0 %v1502_v1  ;;  %931 = vmatprep.mubr.bf16.mxu1 %v1502_v1 }
 0x436   :  { %v733_v58 = vadd.f32 %v729_v56, %v1772_v60 }
 0x437   :  { %861 = vmatpush1.bf16.msra.mxu0 %v1546_v4  ;;  %902 = vmatpush1.bf16.msra.mxu1 %v1586_v11  ;;  %v728_v4 = vunpack.c.h.bf16 %v1272_v2  ;;  %v730_v11 = vunpack.c.h.bf16 %v1273_v7  ;;  %v1991_v7 = vld [vmem:[%s2171_s1 + $0x2c] ss:$16 sps:$4 sm:$0xff]  }
 0x438   :  { %862 = vmatprep.subr.bf16.mxu0 %v1552_v5  ;;  %903 = vmatprep.subr.bf16.mxu1 %v1603_v14  ;;  %v731_v5 = vadd.f32 %v727_v3, %v1760_v40 }
 0x439   :  { %v734_v49 = vadd.f32 %v730_v11, %v1769_v48  ;;  %v2018_v11 = vld [vmem:[%s2171_s1 + $0x40] ss:$16 sps:$4 sm:$0xff]  }
 0x43b   :  { %863 = vmatpush1.bf16.msra.mxu0 %v1568_v8  ;;  %904 = vmatpush1.bf16.msra.mxu1 %v1610_v15  ;;  %v732_v8 = vadd.f32 %v728_v4, %v1762_v42  ;;  %v1973_v4 = vld [vmem:[%s2171_s1] ss:$16 sps:$4 sm:$0xff]  }
 0x43c   :  { %864 = vmatprep.subr.bf16.mxu0 %v1575_v9  ;;  %905 = vmatprep.subr.bf16.mxu1 %v1616_v16 }
 0x43f   :  { %865 = vmatpush1.bf16.msra.mxu0 %v1593_v12  ;;  %906 = vmatpush1.bf16.msra.mxu1 %v1634_v19 }
 0x440   :  { %866 = vmatprep.subr.bf16.mxu0 %v1598_v13  ;;  %907 = vmatprep.subr.bf16.mxu1 %v1640_v20 }
 0x443   :  { %867 = vmatpush1.bf16.msra.mxu0 %v1622_v17  ;;  %908 = vmatpush1.bf16.msra.mxu1 %v1658_v23 }
 0x444   :  { %868 = vmatprep.subr.bf16.mxu0 %v1628_v18  ;;  %909 = vmatprep.subr.bf16.mxu1 %v1664_v24 }
 0x447   :  { %869 = vmatpush1.bf16.msra.mxu0 %v1646_v21  ;;  %910 = vmatpush1.bf16.msra.mxu1 %v1682_v27 }
 0x448   :  { %870 = vmatprep.subr.bf16.mxu0 %v1651_v22  ;;  %911 = vmatprep.subr.bf16.mxu1 %v1688_v28 }
 0x44b   :  { %871 = vmatpush1.bf16.msra.mxu0 %v1670_v25  ;;  %912 = vmatpush1.bf16.msra.mxu1 %v1701_v30 }
 0x44c   :  { %872 = vmatprep.subr.bf16.mxu0 %v1676_v26  ;;  %913 = vmatprep.subr.bf16.mxu1 %v1707_v31 }
 0x44f   :  { %873 = vmatpush1.bf16.msra.mxu0 %v1694_v29  ;;  %914 = vmatpush1.bf16.msra.mxu1 %v1714_v32 }
 0x450   :  { %980 = vmatprep.subr.bf16.mxu0 %v1527_v0  ;;  %1021 = vmatprep.subr.bf16.mxu1 %v1557_v6 }
 0x505   :  { %v770_v9 = vpop.f32.mrb[16].mxu0  ;;  %v811_v10 = vpop.f32.mrb[16].mxu1 }
 0x506   :  { %v818_v0 = vadd.f32 %v770_v9, %v731_v5  ;;  %v772_v12 = vpop.f32.mrb[17].mxu0  ;;  %v813_v6 = vpop.f32.mrb[17].mxu1  ;;  %v820_v61 = vadd.f32 %v811_v10, %v733_v58  ;;  %v1985_v5 = vld [vmem:[%s2171_s1 + $0x24] ss:$16 sps:$4 sm:$0xff]   ;;  %v2005_v9 = vld [vmem:[%s2171_s1 + $0x28] ss:$16 sps:$4 sm:$0xff]  }
 0x507   :  { %v819_v13 = vadd.f32 %v772_v12, %v732_v8  ;;  %v774_v57 = vpop.f32.mrb[18].mxu0  ;;  %v815_v47 = vpop.f32.mrb[18].mxu1  ;;  %v821_v52 = vadd.f32 %v813_v6, %v734_v49  ;;  %v1999_v8 = vld [vmem:[%s2171_s1 + $0x20] ss:$16 sps:$4 sm:$0xff]   ;;  %v2011_v10 = vld [vmem:[%s2171_s1 + $0x44] ss:$16 sps:$4 sm:$0xff]  }
 0x508   :  { %v1274_v50 = vmul.f32 -1.442695, %v818_v0  ;;  %v775_v51 = vpop.f32.mrb[19].mxu0  ;;  %v816_v54 = vpop.f32.mrb[19].mxu1  ;;  %v2025_v0 = vld [vmem:[%s2171_s1 + $0x64] ss:$16 sps:$4 sm:$0xff]  }
 0x509   :  { %v1275_v55 = vmul.f32 -1.442695, %v819_v13  ;;  %v1276_v59 = vmul.f32 -1.442695, %v821_v52 }
 0x50a   :  { %1406 = vpow2.f32 %v1274_v50 }
 0x50b   :  { %1408 = vpow2.f32 %v1275_v55 }
 0x50c   :  { %1410 = vpow2.f32 %v1276_v59 }
 0x50d   :  { %1412 = vtanh.f32 %v820_v61 }
 0x514   :  { %v1407_v41 = vpop.eup %1406 }
 0x515   :  { %v1409_v62 = vpop.eup %1408  ;;  %v825_v33 = vadd.f32 1.0, %v1407_v41 }
 0x516   :  { %v831_v34 = vadd.f32 1.0, %v1409_v62  ;;  %v1411_v38 = vpop.eup %1410 }
 0x517   :  { %1414 = vrcp.f32 %v825_v33  ;;  %v1413_v63 = vpop.eup %1412  ;;  %v838_v44 = vadd.f32 1.0, %v1411_v38 }
 0x518   :  { %1416 = vrcp.f32 %v831_v34 }
 0x519   :  { %1418 = vrcp.f32 %v838_v44 }
 0x521   :  { %v1415_v35 = vpop.eup %1414 }
 0x522   :  { %v1417_v43 = vpop.eup %1416  ;;  %v842_v36 = vmul.f32 %v1415_v35, %v1413_v63 }
 0x523   :  { %v841_v39 = vmul.f32 %v1417_v43, %v1919_v46  ;;  %v1419_v37 = vpop.eup %1418  ;;  %v1979_v46 = vld [vmem:[%s2171_s1 + $0x8] ss:$16 sps:$4 sm:$0xff]  }
 0x525   :  { %v1967_v53 = vadd.f32 %v842_v36, %v841_v39 }
 0x527   :  { %1420 = vtanh.f32 %v1967_v53 }
 0x531   :  { %v1421_v45 = vpop.eup %1420 }
 0x532   :  { %v845_v2 = vmul.f32 %v1421_v45, %v1419_v37  ;;  %v1484_v37 = vld [vmem:[%s2171_s1 + $0x48] ss:$16 sps:$4 sm:$0xff]  }
 0x533   :  { %v1486_v45 = vld [vmem:[%s2171_s1 + $0x68] ss:$16 sps:$4 sm:$0xff]  }
 0x534   :  { %v857_v3 = vpack.c.bf16 %v845_v2, %v845_v2  ;;  %v1487_v2 = vld [vmem:[%s2171_s1 + $0x8c] ss:$16 sps:$4 sm:$0xff]  }
 0x536   :  { %891 = vmatmul.mubr.bf16.vlgmr.msra.gmra.mrb[20].mxu0 %v857_v3  ;;  %932 = vmatmul.mubr.bf16.vlgmr.msra.gmra.mrb[20].mxu1 %v857_v3  ;;  %v1488_v3 = vld [vmem:[%s2171_s1 + $0x80] ss:$16 sps:$4 sm:$0xff]  }
 0x537   :  { %981 = vmatpush1.bf16.msra.mxu0 %v1973_v4  ;;  %1022 = vmatpush1.bf16.msra.mxu1 %v1979_v46 }
 0x538   :  { %982 = vmatprep.subr.bf16.mxu0 %v1985_v5  ;;  %1023 = vmatprep.subr.bf16.mxu1 %v1991_v7 }
 0x539   :  { %1012 = vmatprep.mubr.bf16.mxu0 %v1502_v1  ;;  %1053 = vmatprep.mubr.bf16.mxu1 %v1502_v1 }
 0x53b   :  { %983 = vmatpush1.bf16.msra.mxu0 %v1999_v8  ;;  %1024 = vmatpush1.bf16.msra.mxu1 %v2005_v9 }
 0x53c   :  { %984 = vmatprep.subr.bf16.mxu0 %v2011_v10  ;;  %1025 = vmatprep.subr.bf16.mxu1 %v1603_v14  ;;  %v2032_v14 = vld [vmem:[%s2171_s1 + $0x60] ss:$16 sps:$4 sm:$0xff]  }
 0x53f   :  { %985 = vmatpush1.bf16.msra.mxu0 %v2018_v11  ;;  %1026 = vmatpush1.bf16.msra.mxu1 %v1610_v15  ;;  %v2039_v15 = vld [vmem:[%s2171_s1 + $0x84] ss:$16 sps:$4 sm:$0xff]  }
 0x540   :  { %986 = vmatprep.subr.bf16.mxu0 %v2025_v0  ;;  %1027 = vmatprep.subr.bf16.mxu1 %v1616_v16  ;;  %v1481_v16 = vld [vmem:[%s2171_s1 + $0x4] ss:$16 sps:$4 sm:$0xff]  }
 0x543   :  { %987 = vmatpush1.bf16.msra.mxu0 %v2032_v14  ;;  %1028 = vmatpush1.bf16.msra.mxu1 %v1634_v19 }
 0x544   :  { %988 = vmatprep.subr.bf16.mxu0 %v2039_v15  ;;  %1029 = vmatprep.subr.bf16.mxu1 %v1640_v20 }
 0x547   :  { %989 = vmatpush1.bf16.msra.mxu0 %v1622_v17  ;;  %1030 = vmatpush1.bf16.msra.mxu1 %v1658_v23  ;;  %v1482_v17 = vld [vmem:[%s2171_s1 + $0xc] ss:$16 sps:$4 sm:$0xff]  }
 0x548   :  { %990 = vmatprep.subr.bf16.mxu0 %v1628_v18  ;;  %1031 = vmatprep.subr.bf16.mxu1 %v1664_v24  ;;  %v1277_v18 = vld [vmem:[%s2172_s0 + $0x50] sm:$0xff] }
 0x549   :  { %v849_v19 = vunpack.c.l.bf16 %v1277_v18  ;;  %v850_v20 = vunpack.c.h.bf16 %v1277_v18  ;;  %v1282_v18 = vld [vmem:[%s2172_s0 + $0x60] sm:$0xff] }
 0x54b   :  { %991 = vmatpush1.bf16.msra.mxu0 %v1646_v21  ;;  %1032 = vmatpush1.bf16.msra.mxu1 %v1682_v27  ;;  %v853_v21 = vadd.f32 %v849_v19, %v1760_v40  ;;  %v854_v23 = vadd.f32 %v850_v20, %v1762_v42  ;;  %v971_v19 = vunpack.c.l.bf16 %v1282_v18  ;;  %v972_v20 = vunpack.c.h.bf16 %v1282_v18 }
 0x54c   :  { %992 = vmatprep.subr.bf16.mxu0 %v1651_v22  ;;  %1033 = vmatprep.subr.bf16.mxu1 %v1688_v28  ;;  %v1278_v22 = vld [vmem:[%s2172_s0 + $0x58] sm:$0xff] }
 0x54d   :  { %v851_v50 = vunpack.c.l.bf16 %v1278_v22 }
 0x54f   :  { %993 = vmatpush1.bf16.msra.mxu0 %v1670_v25  ;;  %1034 = vmatpush1.bf16.msra.mxu1 %v1701_v30  ;;  %v855_v54 = vadd.f32 %v851_v50, %v1772_v60 }
 0x550   :  { %994 = vmatprep.subr.bf16.mxu0 %v1676_v26  ;;  %1035 = vmatprep.subr.bf16.mxu1 %v1707_v31  ;;  %v852_v26 = vunpack.c.h.bf16 %v1278_v22  ;;  %v1283_v22 = vld [vmem:[%s2172_s0 + $0x68] sm:$0xff] }
 0x551   :  { %v973_v50 = vunpack.c.l.bf16 %v1283_v22 }
 0x552   :  { %v856_v47 = vadd.f32 %v852_v26, %v1769_v48  ;;  %v974_v26 = vunpack.c.h.bf16 %v1283_v22 }
 0x553   :  { %995 = vmatpush1.bf16.msra.mxu0 %v1694_v29  ;;  %1036 = vmatpush1.bf16.msra.mxu1 %v1714_v32 }
 0x554   :  { %1102 = vmatprep.subr.bf16.mxu0 %v1481_v16  ;;  %1143 = vmatprep.subr.bf16.mxu1 %v1482_v17  ;;  %v1500_v16 = vld [vmem:[%s2171_s1 + $0xe0] ss:$16 sps:$4 sm:$0xff]   ;;  %v1501_v17 = vld [vmem:[%s2171_s1 + $0xe8] ss:$16 sps:$4 sm:$0xff]  }
 0x609   :  { %v892_v24 = vpop.f32.mrb[20].mxu0  ;;  %v933_v25 = vpop.f32.mrb[20].mxu1 }
 0x60a   :  { %v940_v27 = vadd.f32 %v892_v24, %v853_v21  ;;  %v894_v28 = vpop.f32.mrb[21].mxu0  ;;  %v935_v29 = vpop.f32.mrb[21].mxu1  ;;  %v942_v49 = vadd.f32 %v933_v25, %v855_v54  ;;  %v975_v21 = vadd.f32 %v971_v19, %v1760_v40  ;;  %v977_v54 = vadd.f32 %v973_v50, %v1772_v60 }
 0x60b   :  { %v941_v30 = vadd.f32 %v894_v28, %v854_v23  ;;  %v896_v31 = vpop.f32.mrb[22].mxu0  ;;  %v937_v32 = vpop.f32.mrb[22].mxu1  ;;  %v943_v51 = vadd.f32 %v935_v29, %v856_v47  ;;  %v976_v23 = vadd.f32 %v972_v20, %v1762_v42  ;;  %v978_v47 = vadd.f32 %v974_v26, %v1769_v48 }
 0x60c   :  { %v1279_v12 = vmul.f32 -1.442695, %v940_v27  ;;  %v897_v6 = vpop.f32.mrb[23].mxu0  ;;  %v938_v13 = vpop.f32.mrb[23].mxu1 }
 0x60d   :  { %v1280_v57 = vmul.f32 -1.442695, %v941_v30  ;;  %v1281_v55 = vmul.f32 -1.442695, %v943_v51 }
 0x60e   :  { %1422 = vpow2.f32 %v1279_v12 }
 0x60f   :  { %1424 = vpow2.f32 %v1280_v57 }
 0x610   :  { %1426 = vpow2.f32 %v1281_v55 }
 0x611   :  { %1428 = vtanh.f32 %v942_v49 }
 0x618   :  { %v1423_v56 = vpop.eup %1422 }
 0x619   :  { %v1425_v52 = vpop.eup %1424  ;;  %v947_v58 = vadd.f32 1.0, %v1423_v56 }
 0x61a   :  { %v953_v59 = vadd.f32 1.0, %v1425_v52  ;;  %v1427_v61 = vpop.eup %1426 }
 0x61b   :  { %1430 = vrcp.f32 %v947_v58  ;;  %v1429_v41 = vpop.eup %1428  ;;  %v960_v38 = vadd.f32 1.0, %v1427_v61 }
 0x61c   :  { %1432 = vrcp.f32 %v953_v59 }
 0x61d   :  { %1434 = vrcp.f32 %v960_v38 }
 0x625   :  { %v1431_v62 = vpop.eup %1430 }
 0x626   :  { %v1433_v33 = vpop.eup %1432  ;;  %v964_v34 = vmul.f32 %v1431_v62, %v1429_v41 }
 0x627   :  { %v963_v63 = vmul.f32 %v1433_v33, %v1967_v53  ;;  %v1435_v43 = vpop.eup %1434  ;;  %v1483_v53 = vld [vmem:[%s2171_s1 + $0x4c] ss:$16 sps:$4 sm:$0xff]  }
 0x629   :  { %v2074_v35 = vadd.f32 %v964_v34, %v963_v63 }
 0x62b   :  { %1436 = vtanh.f32 %v2074_v35 }
 0x635   :  { %v1437_v36 = vpop.eup %1436 }
 0x636   :  { %v967_v44 = vmul.f32 %v1437_v36, %v1435_v43 }
 0x638   :  { %v979_v39 = vpack.c.bf16 %v967_v44, %v967_v44 }
 0x63a   :  { %1013 = vmatmul.mubr.bf16.vlgmr.msra.gmra.mrb[24].mxu0 %v979_v39  ;;  %1054 = vmatmul.mubr.bf16.vlgmr.msra.gmra.mrb[24].mxu1 %v979_v39 }
 0x63b   :  { %1103 = vmatpush1.bf16.msra.mxu0 %v1973_v4  ;;  %1144 = vmatpush1.bf16.msra.mxu1 %v1979_v46  ;;  %v1489_v4 = vld [vmem:[%s2171_s1 + $0x88] ss:$16 sps:$4 sm:$0xff]   ;;  %v1490_v46 = vld [vmem:[%s2171_s1 + $0xa4] ss:$16 sps:$4 sm:$0xff]  }
 0x63c   :  { %1104 = vmatprep.subr.bf16.mxu0 %v1985_v5  ;;  %1145 = vmatprep.subr.bf16.mxu1 %v1991_v7  ;;  %v1491_v5 = vld [vmem:[%s2171_s1 + $0xac] ss:$16 sps:$4 sm:$0xff]   ;;  %v1492_v7 = vld [vmem:[%s2171_s1 + $0xa0] ss:$16 sps:$4 sm:$0xff]  }
 0x63d   :  { %1134 = vmatprep.mubr.bf16.mxu0 %v1502_v1  ;;  %1175 = vmatprep.mubr.bf16.mxu1 %v1502_v1  ;;  %v1485_v1 = vld [vmem:[%s2171_s1 + $0x6c] ss:$16 sps:$4 sm:$0xff]  }
 0x63f   :  { %1105 = vmatpush1.bf16.msra.mxu0 %v1999_v8  ;;  %1146 = vmatpush1.bf16.msra.mxu1 %v2005_v9  ;;  %v1493_v8 = vld [vmem:[%s2171_s1 + $0xa8] ss:$16 sps:$4 sm:$0xff]   ;;  %v1494_v9 = vld [vmem:[%s2171_s1 + $0xc4] ss:$16 sps:$4 sm:$0xff]  }
 0x640   :  { %1106 = vmatprep.subr.bf16.mxu0 %v2011_v10  ;;  %1147 = vmatprep.subr.bf16.mxu1 %v1483_v53  ;;  %v1495_v10 = vld [vmem:[%s2171_s1 + $0xcc] ss:$16 sps:$4 sm:$0xff]  }
 0x643   :  { %1107 = vmatpush1.bf16.msra.mxu0 %v2018_v11  ;;  %1148 = vmatpush1.bf16.msra.mxu1 %v1484_v37  ;;  %v1496_v11 = vld [vmem:[%s2171_s1 + $0xc0] ss:$16 sps:$4 sm:$0xff]  }
 0x644   :  { %1108 = vmatprep.subr.bf16.mxu0 %v2025_v0  ;;  %1149 = vmatprep.subr.bf16.mxu1 %v1485_v1  ;;  %v1497_v0 = vld [vmem:[%s2171_s1 + $0xc8] ss:$16 sps:$4 sm:$0xff]   ;;  %v1287_v37 = vld [vmem:[%s2172_s0 + $0x70] sm:$0xff] }
 0x645   :  { %v1093_v1 = vunpack.c.l.bf16 %v1287_v37 }
 0x647   :  { %1109 = vmatpush1.bf16.msra.mxu0 %v2032_v14  ;;  %1150 = vmatpush1.bf16.msra.mxu1 %v1486_v45  ;;  %v1498_v14 = vld [vmem:[%s2171_s1 + $0xe4] ss:$16 sps:$4 sm:$0xff]   ;;  %v1094_v45 = vunpack.c.h.bf16 %v1287_v37 }
 0x648   :  { %1110 = vmatprep.subr.bf16.mxu0 %v2039_v15  ;;  %1151 = vmatprep.subr.bf16.mxu1 %v1487_v2  ;;  %v1499_v15 = vld [vmem:[%s2171_s1 + $0xec] ss:$16 sps:$4 sm:$0xff]   ;;  %v1097_v2 = vadd.f32 %v1093_v1, %v1760_v40 }
 0x64b   :  { %1111 = vmatpush1.bf16.msra.mxu0 %v1488_v3  ;;  %1152 = vmatpush1.bf16.msra.mxu1 %v1489_v4  ;;  %v1098_v3 = vadd.f32 %v1094_v45, %v1762_v42 }
 0x64c   :  { %1112 = vmatprep.subr.bf16.mxu0 %v1490_v46  ;;  %1153 = vmatprep.subr.bf16.mxu1 %v1491_v5 }
 0x64f   :  { %1113 = vmatpush1.bf16.msra.mxu0 %v1492_v7  ;;  %1154 = vmatpush1.bf16.msra.mxu1 %v1493_v8 }
 0x650   :  { %1114 = vmatprep.subr.bf16.mxu0 %v1494_v9  ;;  %1155 = vmatprep.subr.bf16.mxu1 %v1495_v10 }
 0x653   :  { %1115 = vmatpush1.bf16.msra.mxu0 %v1496_v11  ;;  %1156 = vmatpush1.bf16.msra.mxu1 %v1497_v0 }
 0x654   :  { %1116 = vmatprep.subr.bf16.mxu0 %v1498_v14  ;;  %1157 = vmatprep.subr.bf16.mxu1 %v1499_v15 }
 0x657   :  { %1117 = vmatpush1.bf16.msra.mxu0 %v1500_v16  ;;  %1158 = vmatpush1.bf16.msra.mxu1 %v1501_v17 }
 0x70d   :  { %v1014_v24 = vpop.f32.mrb[24].mxu0  ;;  %v1055_v25 = vpop.f32.mrb[24].mxu1 }
 0x70e   :  { %v1062_v27 = vadd.f32 %v1014_v24, %v975_v21  ;;  %v1016_v28 = vpop.f32.mrb[25].mxu0  ;;  %v1057_v29 = vpop.f32.mrb[25].mxu1  ;;  %v1064_v49 = vadd.f32 %v1055_v25, %v977_v54 }
 0x70f   :  { %v1063_v30 = vadd.f32 %v1016_v28, %v976_v23  ;;  %v1018_v31 = vpop.f32.mrb[26].mxu0  ;;  %v1059_v32 = vpop.f32.mrb[26].mxu1  ;;  %v1065_v51 = vadd.f32 %v1057_v29, %v978_v47 }
 0x710   :  { %v1284_v12 = vmul.f32 -1.442695, %v1062_v27  ;;  %v1019_v6 = vpop.f32.mrb[27].mxu0  ;;  %v1060_v13 = vpop.f32.mrb[27].mxu1 }
 0x711   :  { %v1285_v57 = vmul.f32 -1.442695, %v1063_v30  ;;  %v1286_v55 = vmul.f32 -1.442695, %v1065_v51 }
 0x712   :  { %1438 = vpow2.f32 %v1284_v12 }
 0x713   :  { %1440 = vpow2.f32 %v1285_v57 }
 0x714   :  { %1442 = vpow2.f32 %v1286_v55 }
 0x715   :  { %1444 = vtanh.f32 %v1064_v49 }
 0x71c   :  { %v1439_v56 = vpop.eup %1438 }
 0x71d   :  { %v1441_v52 = vpop.eup %1440  ;;  %v1069_v58 = vadd.f32 1.0, %v1439_v56 }
 0x71e   :  { %v1075_v59 = vadd.f32 1.0, %v1441_v52  ;;  %v1443_v61 = vpop.eup %1442 }
 0x71f   :  { %1446 = vrcp.f32 %v1069_v58  ;;  %v1445_v41 = vpop.eup %1444  ;;  %v1082_v38 = vadd.f32 1.0, %v1443_v61 }
 0x720   :  { %1448 = vrcp.f32 %v1075_v59 }
 0x721   :  { %1450 = vrcp.f32 %v1082_v38 }
 0x729   :  { %v1447_v62 = vpop.eup %1446 }
 0x72a   :  { %v1449_v33 = vpop.eup %1448  ;;  %v1086_v34 = vmul.f32 %v1447_v62, %v1445_v41 }
 0x72b   :  { %v1085_v63 = vmul.f32 %v1449_v33, %v2074_v35  ;;  %v1451_v36 = vpop.eup %1450  ;;  %v1288_v35 = vld [vmem:[%s2172_s0 + $0x78] sm:$0xff] }
 0x72c   :  { %v1096_v5 = vunpack.c.h.bf16 %v1288_v35  ;;  %v1095_v18 = vunpack.c.l.bf16 %v1288_v35 }
 0x72d   :  { %v1087_v43 = vadd.f32 %v1086_v34, %v1085_v63 }
 0x72e   :  { %v1100_v40 = vadd.f32 %v1096_v5, %v1769_v48  ;;  %v1099_v42 = vadd.f32 %v1095_v18, %v1772_v60 }
 0x72f   :  { %1452 = vtanh.f32 %v1087_v43 }
 0x739   :  { %v1453_v44 = vpop.eup %1452 }
 0x73a   :  { %v1089_v39 = vmul.f32 %v1453_v44, %v1451_v36 }
 0x73c   :  { %v1101_v53 = vpack.c.bf16 %v1089_v39, %v1089_v39 }
 0x73e   :  { %1135 = vmatmul.mubr.bf16.vlgmr.msra.gmra.mrb[28].mxu0 %v1101_v53  ;;  %1176 = vmatmul.mubr.bf16.vlgmr.msra.gmra.mrb[28].mxu1 %v1101_v53 }
 0x811   :  { %v1136_v4 = vpop.f32.mrb[28].mxu0  ;;  %v1177_v46 = vpop.f32.mrb[28].mxu1 }
 0x812   :  { %v1184_v7 = vadd.f32 %v1136_v4, %v1097_v2  ;;  %v1138_v8 = vpop.f32.mrb[29].mxu0  ;;  %v1179_v9 = vpop.f32.mrb[29].mxu1  ;;  %v1186_v21 = vadd.f32 %v1177_v46, %v1099_v42 }
 0x813   :  { %v1185_v10 = vadd.f32 %v1138_v8, %v1098_v3  ;;  %v1140_v11 = vpop.f32.mrb[30].mxu0  ;;  %v1181_v0 = vpop.f32.mrb[30].mxu1  ;;  %v1187_v19 = vadd.f32 %v1179_v9, %v1100_v40 }
 0x814   :  { %v1289_v14 = vmul.f32 -1.442695, %v1184_v7  ;;  %v1141_v15 = vpop.f32.mrb[31].mxu0  ;;  %v1182_v16 = vpop.f32.mrb[31].mxu1 }
 0x815   :  { %v1290_v17 = vmul.f32 -1.442695, %v1185_v10  ;;  %v1291_v20 = vmul.f32 -1.442695, %v1187_v19 }
 0x816   :  { %1454 = vpow2.f32 %v1289_v14 }
 0x817   :  { %1456 = vpow2.f32 %v1290_v17 }
 0x818   :  { %1458 = vpow2.f32 %v1291_v20 }
 0x819   :  { %1460 = vtanh.f32 %v1186_v21 }
 0x820   :  { %v1455_v22 = vpop.eup %1454 }
 0x821   :  { %v1457_v23 = vpop.eup %1456  ;;  %v1191_v24 = vadd.f32 1.0, %v1455_v22 }
 0x822   :  { %v1197_v25 = vadd.f32 1.0, %v1457_v23  ;;  %v1459_v26 = vpop.eup %1458 }
 0x823   :  { %1462 = vrcp.f32 %v1191_v24  ;;  %v1461_v27 = vpop.eup %1460  ;;  %v1204_v30 = vadd.f32 1.0, %v1459_v26 }
 0x824   :  { %1464 = vrcp.f32 %v1197_v25 }
 0x825   :  { %1466 = vrcp.f32 %v1204_v30 }
 0x82d   :  { %v1463_v28 = vpop.eup %1462 }
 0x82e   :  { %v1465_v48 = vpop.eup %1464  ;;  %v1208_v29 = vmul.f32 %v1463_v28, %v1461_v27 }
 0x82f   :  { %v1207_v31 = vmul.f32 %v1465_v48, %v1087_v43  ;;  %v1467_v60 = vpop.eup %1466 }
 0x831   :  { %v1209_v32 = vadd.f32 %v1208_v29, %v1207_v31 }
 0x833   :  { %1468 = vtanh.f32 %v1209_v32 }
 0x83d   :  { %v1469_v12 = vpop.eup %1468 }
 0x83e   :  { %v1211_v6 = vmul.f32 %v1469_v12, %v1467_v60 }
 0x840   :  { %1217 = vst [vmem:[%s2174_s3] sm:$0xff] %v1211_v6 }

</bundles_post_ra>
